<compile_context>
chip_gen: v7x
topology: tpu7x:2x2x1
jax: 0.10.0
libtpu: 0.0.40
codegen_flags: <defaults>
</compile_context>

<pallas_src>
import jax
import jax.numpy as jnp
from jax import lax
from jax.experimental import pallas as pl
from jax.experimental.pallas import tpu as pltpu


# ----------------------------- Pallas kernel ------------------------------- #

def rcab_kernel(x_ref, w1_ref, b1_ref, w2_ref, b2_ref,
                wd1_ref, bd1_ref, wd2_ref, bd2_ref, out_ref):
    """One batch image per grid step, lane-dense (H, W*C) layout."""
    _, H, WC = x_ref.shape
    x = x_ref[0]                       # (H, WC) f32: conv1 input + residual
    cdt = w1_ref.dtype                 # MXU operand dtype (bf16 or f32)

    # (H, H) row-shift matrices built from 2-D iota:
    #   (s_dn @ v)[h] = v[h-1]  (zero row at h = 0)
    #   (s_up @ v)[h] = v[h+1]  (zero row at h = H-1)
    # -> 'SAME' zero padding along H with no padded scratch / masked copies.
    row = lax.broadcasted_iota(jnp.int32, (H, H), 0)
    col = lax.broadcasted_iota(jnp.int32, (H, H), 1)
    s_dn = jnp.where(col + 1 == row, 1.0, 0.0)    # col == row - 1
    s_up = jnp.where(col == row + 1, 1.0, 0.0)    # col == row + 1

    def conv3x3(v, w_ref, b_ref):
        # v: (H, WC) f32.  w_ref: (3, WC, WC) block-banded (dx + W-padding
        # folded into the K=WC contraction).  Returns f32 (bias added).
        v_prev = jnp.dot(s_dn, v, preferred_element_type=jnp.float32)   # dy = 0
        v_next = jnp.dot(s_up, v, preferred_element_type=jnp.float32)   # dy = 2
        acc = jnp.dot(v_prev.astype(cdt), w_ref[0],
                      preferred_element_type=jnp.float32)
        acc += jnp.dot(v.astype(cdt), w_ref[1],
                       preferred_element_type=jnp.float32)
        acc += jnp.dot(v_next.astype(cdt), w_ref[2],
                       preferred_element_type=jnp.float32)
        return acc + b_ref[...]        # (1, WC) bias broadcasts over rows

    h1 = jnp.maximum(conv3x3(x, w1_ref, b1_ref), 0.0)    # conv1 + ReLU
    res = conv3x3(h1, w2_ref, b2_ref)                     # conv2

    # Channel attention (CALayer).  Global average pool: sum over H here; the
    # sum over W and the 1/(H*W) factor are folded into wd1 (tiled wrapper-side).
    pooled = jnp.sum(res, axis=0, keepdims=True)          # (1, WC)
    y1 = jnp.dot(pooled, wd1_ref[...],
                 preferred_element_type=jnp.float32) + bd1_ref[...]
    y1 = jnp.maximum(y1, 0.0)                             # (1, C // r)
    y2 = jnp.dot(y1, wd2_ref[...],
                 preferred_element_type=jnp.float32) + bd2_ref[...]
    scale = jax.nn.sigmoid(y2)                            # (1, WC), lane-dense gate

    out_ref[0] = (res * scale + x).astype(out_ref.dtype)  # unmasked lane-dense store


# ------------------------------- wrapper ----------------------------------- #

def _band_conv_weights(w_hwio, W, dtype):
    """(3, 3, Cin, Cout) HWIO -> (3, W*Cin, W*Cout) block-banded matrices.

    band[dy][w_in*C + ci, w_out*C + co] = w[dy, w_in - w_out + 1, ci, co]
    (zero outside the band), so a matmul on the lane-dense (H, W*C) layout
    performs the three dx taps and the 'SAME' zero padding along W in one go.
    """
    kh, kw, cin, cout = w_hwio.shape
    mats = []
    for dy in range(kh):
        m = jnp.zeros((W * cin, W * cout), w_hwio.dtype)
        for dx in range(kw):
            # P_dx[w_in, w_out] = 1  iff  w_in == w_out + dx - 1
            m = m + jnp.kron(jnp.eye(W, k=1 - dx, dtype=w_hwio.dtype),
                             w_hwio[dy, dx])
        mats.append(m)
    return jnp.stack(mats).astype(dtype)


def rcab_pallas(x_nhwc, params, *, compute_dtype=jnp.bfloat16):
    """x_nhwc: (B, H, W, C) float32. params: dict of HWIO weights (init_params)."""
    B, H, W, C = x_nhwc.shape
    WC = W * C
    Cr = params["wd1"].shape[1]

    # ---- wrapper glue: lane-dense activations + reshaped / tiled weights ----
    x_lane = x_nhwc.reshape(B, H, WC)
    w1b = _band_conv_weights(params["w1"], W, compute_dtype)            # (3, WC, WC)
    w2b = _band_conv_weights(params["w2"], W, compute_dtype)            # (3, WC, WC)
    b1l = jnp.tile(params["b1"], (1, W)).astype(jnp.float32)            # (1, WC)
    b2l = jnp.tile(params["b2"], (1, W)).astype(jnp.float32)            # (1, WC)
    # CA down-proj tiled over W with the 1/(H*W) mean folded in.
    wd1l = (jnp.tile(params["wd1"], (W, 1)) / float(H * W)).astype(jnp.float32)  # (WC, Cr)
    bd1 = params["bd1"].astype(jnp.float32)                             # (1, Cr)
    wd2l = jnp.tile(params["wd2"], (1, W)).astype(jnp.float32)          # (Cr, WC)
    bd2l = jnp.tile(params["bd2"], (1, W)).astype(jnp.float32)          # (1, WC)

    wbytes = jnp.dtype(compute_dtype).itemsize
    cost = pl.CostEstimate(
        flops=int(B * (4 * 2 * H * H * WC          # row-shift matmuls
                       + 6 * 2 * H * WC * WC       # band matmuls (2 convs x 3)
                       + 4 * 2 * WC * Cr           # channel-attention matmuls
                       + 8 * H * WC)),             # elementwise epilogue
        transcendentals=int(B * WC),               # sigmoid
        bytes_accessed=int(2 * B * H * WC * 4                      # x in + out
                           + 2 * 3 * WC * WC * wbytes              # band weights
                           + (2 * WC + WC * Cr + Cr + WC) * 4),    # biases + CA
    )

    grid = (B,)
    in_specs = [
        pl.BlockSpec((1, H, WC), lambda b: (b, 0, 0)),     # x (lane-dense)
        pl.BlockSpec((3, WC, WC), lambda b: (0, 0, 0)),    # conv1 band weight
        pl.BlockSpec((1, WC), lambda b: (0, 0)),           # conv1 bias (tiled over W)
        pl.BlockSpec((3, WC, WC), lambda b: (0, 0, 0)),    # conv2 band weight
        pl.BlockSpec((1, WC), lambda b: (0, 0)),           # conv2 bias
        pl.BlockSpec((WC, Cr), lambda b: (0, 0)),          # CA down-proj (mean folded)
        pl.BlockSpec((1, Cr), lambda b: (0, 0)),           # CA down bias
        pl.BlockSpec((Cr, WC), lambda b: (0, 0)),          # CA up-proj (tiled over W)
        pl.BlockSpec((1, WC), lambda b: (0, 0)),           # CA up bias
    ]
    out_spec = pl.BlockSpec((1, H, WC), lambda b: (b, 0, 0))

    out_lane = pl.pallas_call(
        rcab_kernel,
        out_shape=jax.ShapeDtypeStruct((B, H, WC), x_nhwc.dtype),
        grid=grid,
        in_specs=in_specs,
        out_specs=out_spec,
        compiler_params=pltpu.CompilerParams(
            dimension_semantics=("parallel",),
            vmem_limit_bytes=32 * 1024 * 1024,
        ),
        cost_estimate=cost,
    )(x_lane, w1b, b1l, w2b, b2l, wd1l, bd1, wd2l, bd2l)

    return out_lane.reshape(B, H, W, C)


# ------------------------- pure-JAX reference ------------------------------ #

def rcab_reference(x_nhwc, params):
    """Ground-truth RCAB forward (NHWC / HWIO), mirrors the PyTorch module."""
    dn = ("NHWC", "HWIO", "NHWC")
    res = lax.conv_general_dilated(x_nhwc, params["w1"], (1, 1), "SAME",
                                   dimension_numbers=dn) + params["b1"][0]
    res = jnp.maximum(res, 0.0)
    res = lax.conv_general_dilated(res, params["w2"], (1, 1), "SAME",
                                   dimension_numbers=dn) + params["b2"][0]
    y = jnp.mean(res, axis=(1, 2), keepdims=True)                       # (B,1,1,C)
    y = jnp.maximum(jnp.einsum("bijc,cr->bijr", y, params["wd1"]) + params["bd1"][0], 0.0)
    y = jax.nn.sigmoid(jnp.einsum("bijr,rc->bijc", y, params["wd2"]) + params["bd2"][0])
    return res * y + x_nhwc


def init_params(key, n_feat, reduction, kernel_size=3):
    cr = n_feat // reduction
    ks = jax.random.split(key, 8)
    s = 0.1
    return {
        "w1":  s * jax.random.normal(ks[0], (kernel_size, kernel_size, n_feat, n_feat), jnp.float32),
        "b1":  s * jax.random.normal(ks[1], (1, n_feat), jnp.float32),
        "w2":  s * jax.random.normal(ks[2], (kernel_size, kernel_size, n_feat, n_feat), jnp.float32),
        "b2":  s * jax.random.normal(ks[3], (1, n_feat), jnp.float32),
        "wd1": s * jax.random.normal(ks[4], (n_feat, cr), jnp.float32),
        "bd1": s * jax.random.normal(ks[5], (1, cr), jnp.float32),
        "wd2": s * jax.random.normal(ks[6], (cr, n_feat), jnp.float32),
        "bd2": s * jax.random.normal(ks[7], (1, n_feat), jnp.float32),
    }


if __name__ == "__main__":
    B, C, H, W = 2, 16, 16, 16      # n_feat = 16
    reduction = 4                   # channel-attention hidden = 4
    key = jax.random.PRNGKey(0)
    kx, kp = jax.random.split(key)

    # PyTorch-style NCHW input, permuted to NHWC for the kernel (wrapper glue).
    x_nchw = jax.random.normal(kx, (B, C, H, W), jnp.float32)
    x_nhwc = jnp.transpose(x_nchw, (0, 2, 3, 1))
    params = init_params(kp, C, reduction)

    ref = rcab_reference(x_nhwc, params)

    # Exact path: f32 MXU operands.
    out_f32 = jax.block_until_ready(rcab_pallas(x_nhwc, params, compute_dtype=jnp.float32))
    assert jnp.allclose(out_f32, ref, atol=1e-3, rtol=1e-3), \
        f"f32 mismatch: max abs err {jnp.max(jnp.abs(out_f32 - ref))}"

    # Fast path: bf16 MXU operands (f32 accumulation + f32 elementwise epilogue).
    out_bf16 = jax.block_until_ready(rcab_pallas(x_nhwc, params, compute_dtype=jnp.bfloat16))
    assert jnp.allclose(out_bf16, ref, atol=5e-2, rtol=5e-2), \
        f"bf16 mismatch: max abs err {jnp.max(jnp.abs(out_bf16 - ref))}"

    print("KERNEL_OK")
</pallas_src>

<mosaic_0001>
module attributes {stable_mosaic.version = 11 : i64} {
  func.func @rcab_kernel(%arg0: i32, %arg1: memref<1x16x256xf32, #tpu.memory_space<vmem>>, %arg2: memref<3x256x256xf32, #tpu.memory_space<vmem>>, %arg3: memref<1x256xf32, #tpu.memory_space<vmem>>, %arg4: memref<3x256x256xf32, #tpu.memory_space<vmem>>, %arg5: memref<1x256xf32, #tpu.memory_space<vmem>>, %arg6: memref<256x4xf32, #tpu.memory_space<vmem>>, %arg7: memref<1x4xf32, #tpu.memory_space<vmem>>, %arg8: memref<4x256xf32, #tpu.memory_space<vmem>>, %arg9: memref<1x256xf32, #tpu.memory_space<vmem>>, %arg10: memref<1x16x256xf32, #tpu.memory_space<vmem>>) attributes {dimension_semantics = [#tpu.dimension_semantics<parallel>], iteration_bounds = array<i64: 2>, scalar_prefetch = 0 : i64, scratch_operands = 0 : i64, tpu.core_type = #tpu.core_type<tc>, window_params = [{transform_indices = @transform_0, window_bounds = array<i64: 1, 16, 256>}, {pipeline_mode = #tpu.pipeline_mode<synchronous>, transform_indices = @transform_1, window_bounds = array<i64: 3, 256, 256>}, {pipeline_mode = #tpu.pipeline_mode<synchronous>, transform_indices = @transform_2, window_bounds = array<i64: 1, 256>}, {pipeline_mode = #tpu.pipeline_mode<synchronous>, transform_indices = @transform_3, window_bounds = array<i64: 3, 256, 256>}, {pipeline_mode = #tpu.pipeline_mode<synchronous>, transform_indices = @transform_4, window_bounds = array<i64: 1, 256>}, {pipeline_mode = #tpu.pipeline_mode<synchronous>, transform_indices = @transform_5, window_bounds = array<i64: 256, 4>}, {pipeline_mode = #tpu.pipeline_mode<synchronous>, transform_indices = @transform_6, window_bounds = array<i64: 1, 4>}, {pipeline_mode = #tpu.pipeline_mode<synchronous>, transform_indices = @transform_7, window_bounds = array<i64: 4, 256>}, {pipeline_mode = #tpu.pipeline_mode<synchronous>, transform_indices = @transform_8, window_bounds = array<i64: 1, 256>}, {transform_indices = @transform_9, window_bounds = array<i64: 1, 16, 256>}]} {
    %c0 = arith.constant 0 : index
    %c0_0 = arith.constant 0 : index
    %c0_1 = arith.constant 0 : index
    %0 = vector.load %arg1[%c0, %c0_0, %c0_1] : memref<1x16x256xf32, #tpu.memory_space<vmem>>, vector<1x16x256xf32>
    %1 = vector.shape_cast %0 : vector<1x16x256xf32> to vector<16x256xf32>
    %2 = tpu.iota {dimensions = array<i32: 0>} : vector<16x16xi32>
    %3 = tpu.iota {dimensions = array<i32: 1>} : vector<16x16xi32>
    %c1_i32 = arith.constant 1 : i32
    %4 = vector.broadcast %c1_i32 : i32 to vector<16x16xi32>
    %5 = arith.addi %3, %4 : vector<16x16xi32>
    %6 = arith.cmpi eq, %5, %2 : vector<16x16xi32>
    %cst = arith.constant 1.000000e+00 : f32
    %cst_2 = arith.constant 0.000000e+00 : f32
    %7 = vector.broadcast %cst : f32 to vector<16x16xf32>
    %8 = vector.broadcast %cst_2 : f32 to vector<16x16xf32>
    %9 = arith.select %6, %7, %8 : vector<16x16xi1>, vector<16x16xf32>
    %c1_i32_3 = arith.constant 1 : i32
    %10 = vector.broadcast %c1_i32_3 : i32 to vector<16x16xi32>
    %11 = arith.addi %2, %10 : vector<16x16xi32>
    %12 = arith.cmpi eq, %3, %11 : vector<16x16xi32>
    %cst_4 = arith.constant 1.000000e+00 : f32
    %cst_5 = arith.constant 0.000000e+00 : f32
    %13 = vector.broadcast %cst_4 : f32 to vector<16x16xf32>
    %14 = vector.broadcast %cst_5 : f32 to vector<16x16xf32>
    %15 = arith.select %12, %13, %14 : vector<16x16xi1>, vector<16x16xf32>
    %cst_6 = arith.constant dense<0.000000e+00> : vector<16x256xf32>
    %16 = tpu.matmul %9, %1, %cst_6 {dimension_numbers = #tpu.dot_dimension_numbers<[1], [0], [0], [1], [0, 0, 1, 1], [], []>} : vector<16x16xf32>, vector<16x256xf32>, vector<16x256xf32> -> vector<16x256xf32>
    %cst_7 = arith.constant dense<0.000000e+00> : vector<16x256xf32>
    %17 = tpu.matmul %15, %1, %cst_7 {dimension_numbers = #tpu.dot_dimension_numbers<[1], [0], [0], [1], [0, 0, 1, 1], [], []>} : vector<16x16xf32>, vector<16x256xf32>, vector<16x256xf32> -> vector<16x256xf32>
    %c0_8 = arith.constant 0 : index
    %c0_9 = arith.constant 0 : index
    %c0_10 = arith.constant 0 : index
    %18 = vector.load %arg2[%c0_8, %c0_9, %c0_10] : memref<3x256x256xf32, #tpu.memory_space<vmem>>, vector<1x256x256xf32>
    %19 = vector.shape_cast %18 : vector<1x256x256xf32> to vector<256x256xf32>
    %cst_11 = arith.constant dense<0.000000e+00> : vector<16x256xf32>
    %20 = tpu.matmul %16, %19, %cst_11 {dimension_numbers = #tpu.dot_dimension_numbers<[1], [0], [0], [1], [0, 0, 1, 1], [], []>} : vector<16x256xf32>, vector<256x256xf32>, vector<16x256xf32> -> vector<16x256xf32>
    %c1 = arith.constant 1 : index
    %c0_12 = arith.constant 0 : index
    %c0_13 = arith.constant 0 : index
    %21 = vector.load %arg2[%c1, %c0_12, %c0_13] : memref<3x256x256xf32, #tpu.memory_space<vmem>>, vector<1x256x256xf32>
    %22 = vector.shape_cast %21 : vector<1x256x256xf32> to vector<256x256xf32>
    %cst_14 = arith.constant dense<0.000000e+00> : vector<16x256xf32>
    %23 = tpu.matmul %1, %22, %cst_14 {dimension_numbers = #tpu.dot_dimension_numbers<[1], [0], [0], [1], [0, 0, 1, 1], [], []>} : vector<16x256xf32>, vector<256x256xf32>, vector<16x256xf32> -> vector<16x256xf32>
    %24 = arith.addf %20, %23 : vector<16x256xf32>
    %c2 = arith.constant 2 : index
    %c0_15 = arith.constant 0 : index
    %c0_16 = arith.constant 0 : index
    %25 = vector.load %arg2[%c2, %c0_15, %c0_16] : memref<3x256x256xf32, #tpu.memory_space<vmem>>, vector<1x256x256xf32>
    %26 = vector.shape_cast %25 : vector<1x256x256xf32> to vector<256x256xf32>
    %cst_17 = arith.constant dense<0.000000e+00> : vector<16x256xf32>
    %27 = tpu.matmul %17, %26, %cst_17 {dimension_numbers = #tpu.dot_dimension_numbers<[1], [0], [0], [1], [0, 0, 1, 1], [], []>} : vector<16x256xf32>, vector<256x256xf32>, vector<16x256xf32> -> vector<16x256xf32>
    %28 = arith.addf %24, %27 : vector<16x256xf32>
    %c0_18 = arith.constant 0 : index
    %c0_19 = arith.constant 0 : index
    %29 = vector.load %arg3[%c0_18, %c0_19] : memref<1x256xf32, #tpu.memory_space<vmem>>, vector<1x256xf32>
    %30 = vector.broadcast %29 : vector<1x256xf32> to vector<16x256xf32>
    %31 = arith.addf %28, %30 : vector<16x256xf32>
    %cst_20 = arith.constant 0.000000e+00 : f32
    %32 = vector.broadcast %cst_20 : f32 to vector<16x256xf32>
    %33 = arith.maximumf %31, %32 : vector<16x256xf32>
    %cst_21 = arith.constant dense<0.000000e+00> : vector<16x256xf32>
    %34 = tpu.matmul %9, %33, %cst_21 {dimension_numbers = #tpu.dot_dimension_numbers<[1], [0], [0], [1], [0, 0, 1, 1], [], []>} : vector<16x16xf32>, vector<16x256xf32>, vector<16x256xf32> -> vector<16x256xf32>
    %cst_22 = arith.constant dense<0.000000e+00> : vector<16x256xf32>
    %35 = tpu.matmul %15, %33, %cst_22 {dimension_numbers = #tpu.dot_dimension_numbers<[1], [0], [0], [1], [0, 0, 1, 1], [], []>} : vector<16x16xf32>, vector<16x256xf32>, vector<16x256xf32> -> vector<16x256xf32>
    %c0_23 = arith.constant 0 : index
    %c0_24 = arith.constant 0 : index
    %c0_25 = arith.constant 0 : index
    %36 = vector.load %arg4[%c0_23, %c0_24, %c0_25] : memref<3x256x256xf32, #tpu.memory_space<vmem>>, vector<1x256x256xf32>
    %37 = vector.shape_cast %36 : vector<1x256x256xf32> to vector<256x256xf32>
    %cst_26 = arith.constant dense<0.000000e+00> : vector<16x256xf32>
    %38 = tpu.matmul %34, %37, %cst_26 {dimension_numbers = #tpu.dot_dimension_numbers<[1], [0], [0], [1], [0, 0, 1, 1], [], []>} : vector<16x256xf32>, vector<256x256xf32>, vector<16x256xf32> -> vector<16x256xf32>
    %c1_27 = arith.constant 1 : index
    %c0_28 = arith.constant 0 : index
    %c0_29 = arith.constant 0 : index
    %39 = vector.load %arg4[%c1_27, %c0_28, %c0_29] : memref<3x256x256xf32, #tpu.memory_space<vmem>>, vector<1x256x256xf32>
    %40 = vector.shape_cast %39 : vector<1x256x256xf32> to vector<256x256xf32>
    %cst_30 = arith.constant dense<0.000000e+00> : vector<16x256xf32>
    %41 = tpu.matmul %33, %40, %cst_30 {dimension_numbers = #tpu.dot_dimension_numbers<[1], [0], [0], [1], [0, 0, 1, 1], [], []>} : vector<16x256xf32>, vector<256x256xf32>, vector<16x256xf32> -> vector<16x256xf32>
    %42 = arith.addf %38, %41 : vector<16x256xf32>
    %c2_31 = arith.constant 2 : index
    %c0_32 = arith.constant 0 : index
    %c0_33 = arith.constant 0 : index
    %43 = vector.load %arg4[%c2_31, %c0_32, %c0_33] : memref<3x256x256xf32, #tpu.memory_space<vmem>>, vector<1x256x256xf32>
    %44 = vector.shape_cast %43 : vector<1x256x256xf32> to vector<256x256xf32>
    %cst_34 = arith.constant dense<0.000000e+00> : vector<16x256xf32>
    %45 = tpu.matmul %35, %44, %cst_34 {dimension_numbers = #tpu.dot_dimension_numbers<[1], [0], [0], [1], [0, 0, 1, 1], [], []>} : vector<16x256xf32>, vector<256x256xf32>, vector<16x256xf32> -> vector<16x256xf32>
    %46 = arith.addf %42, %45 : vector<16x256xf32>
    %c0_35 = arith.constant 0 : index
    %c0_36 = arith.constant 0 : index
    %47 = vector.load %arg5[%c0_35, %c0_36] : memref<1x256xf32, #tpu.memory_space<vmem>>, vector<1x256xf32>
    %48 = vector.broadcast %47 : vector<1x256xf32> to vector<16x256xf32>
    %49 = arith.addf %46, %48 : vector<16x256xf32>
    %cst_37 = arith.constant dense<0.000000e+00> : vector<256xf32>
    %50 = vector.multi_reduction <add>, %49, %cst_37 [0] : vector<16x256xf32> to vector<256xf32>
    %51 = vector.shape_cast %50 : vector<256xf32> to vector<1x256xf32>
    %c0_38 = arith.constant 0 : index
    %c0_39 = arith.constant 0 : index
    %52 = vector.load %arg6[%c0_38, %c0_39] : memref<256x4xf32, #tpu.memory_space<vmem>>, vector<256x4xf32>
    %cst_40 = arith.constant dense<0.000000e+00> : vector<1x4xf32>
    %53 = tpu.matmul %51, %52, %cst_40 {dimension_numbers = #tpu.dot_dimension_numbers<[1], [0], [0], [1], [0, 0, 1, 1], [], []>} : vector<1x256xf32>, vector<256x4xf32>, vector<1x4xf32> -> vector<1x4xf32>
    %c0_41 = arith.constant 0 : index
    %c0_42 = arith.constant 0 : index
    %54 = vector.load %arg7[%c0_41, %c0_42] : memref<1x4xf32, #tpu.memory_space<vmem>>, vector<1x4xf32>
    %55 = arith.addf %53, %54 : vector<1x4xf32>
    %cst_43 = arith.constant 0.000000e+00 : f32
    %56 = vector.broadcast %cst_43 : f32 to vector<1x4xf32>
    %57 = arith.maximumf %55, %56 : vector<1x4xf32>
    %c0_44 = arith.constant 0 : index
    %c0_45 = arith.constant 0 : index
    %58 = vector.load %arg8[%c0_44, %c0_45] : memref<4x256xf32, #tpu.memory_space<vmem>>, vector<4x256xf32>
    %cst_46 = arith.constant dense<0.000000e+00> : vector<1x256xf32>
    %59 = tpu.matmul %57, %58, %cst_46 {dimension_numbers = #tpu.dot_dimension_numbers<[1], [0], [0], [1], [0, 0, 1, 1], [], []>} : vector<1x4xf32>, vector<4x256xf32>, vector<1x256xf32> -> vector<1x256xf32>
    %c0_47 = arith.constant 0 : index
    %c0_48 = arith.constant 0 : index
    %60 = vector.load %arg9[%c0_47, %c0_48] : memref<1x256xf32, #tpu.memory_space<vmem>>, vector<1x256xf32>
    %61 = arith.addf %59, %60 : vector<1x256xf32>
    %62 = arith.negf %61 : vector<1x256xf32>
    %63 = math.exp %62 : vector<1x256xf32>
    %cst_49 = arith.constant 1.000000e+00 : f32
    %64 = vector.broadcast %cst_49 : f32 to vector<1x256xf32>
    %65 = arith.addf %64, %63 : vector<1x256xf32>
    %66 = arith.divf %64, %65 : vector<1x256xf32>
    %67 = vector.broadcast %66 : vector<1x256xf32> to vector<16x256xf32>
    %68 = arith.mulf %49, %67 : vector<16x256xf32>
    %69 = arith.addf %68, %1 : vector<16x256xf32>
    %c0_50 = arith.constant 0 : index
    %c0_51 = arith.constant 0 : index
    %c0_52 = arith.constant 0 : index
    %70 = vector.load %arg10[%c0_50, %c0_51, %c0_52] : memref<1x16x256xf32, #tpu.memory_space<vmem>>, vector<1x16x256xf32>
    %71 = vector.shape_cast %70 : vector<1x16x256xf32> to vector<16x256xf32>
    %72 = vector.shape_cast %69 : vector<16x256xf32> to vector<1x16x256xf32>
    tpu.vector_store %arg10[%c0_50, %c0_51, %c0_52], %72 {strides = array<i32>} : memref<1x16x256xf32, #tpu.memory_space<vmem>>, vector<1x16x256xf32>,
    return
  }
  func.func @transform_0(%arg0: i32) -> (i32, i32, i32) {
    %c0_i32 = arith.constant 0 : i32
    %c0_i32_0 = arith.constant 0 : i32
    %c0_i32_1 = arith.constant 0 : i32
    return %arg0, %c0_i32, %c0_i32_0 : i32, i32, i32
  }
  func.func @transform_1(%arg0: i32) -> (i32, i32, i32) {
    %c0_i32 = arith.constant 0 : i32
    %c0_i32_0 = arith.constant 0 : i32
    %c0_i32_1 = arith.constant 0 : i32
    %c0_i32_2 = arith.constant 0 : i32
    return %c0_i32, %c0_i32_0, %c0_i32_1 : i32, i32, i32
  }
  func.func @transform_2(%arg0: i32) -> (i32, i32) {
    %c0_i32 = arith.constant 0 : i32
    %c0_i32_0 = arith.constant 0 : i32
    %c0_i32_1 = arith.constant 0 : i32
    return %c0_i32, %c0_i32_0 : i32, i32
  }
  func.func @transform_3(%arg0: i32) -> (i32, i32, i32) {
    %c0_i32 = arith.constant 0 : i32
    %c0_i32_0 = arith.constant 0 : i32
    %c0_i32_1 = arith.constant 0 : i32
    %c0_i32_2 = arith.constant 0 : i32
    return %c0_i32, %c0_i32_0, %c0_i32_1 : i32, i32, i32
  }
  func.func @transform_4(%arg0: i32) -> (i32, i32) {
    %c0_i32 = arith.constant 0 : i32
    %c0_i32_0 = arith.constant 0 : i32
    %c0_i32_1 = arith.constant 0 : i32
    return %c0_i32, %c0_i32_0 : i32, i32
  }
  func.func @transform_5(%arg0: i32) -> (i32, i32) {
    %c0_i32 = arith.constant 0 : i32
    %c0_i32_0 = arith.constant 0 : i32
    %c0_i32_1 = arith.constant 0 : i32
    return %c0_i32, %c0_i32_0 : i32, i32
  }
  func.func @transform_6(%arg0: i32) -> (i32, i32) {
    %c0_i32 = arith.constant 0 : i32
    %c0_i32_0 = arith.constant 0 : i32
    %c0_i32_1 = arith.constant 0 : i32
    return %c0_i32, %c0_i32_0 : i32, i32
  }
  func.func @transform_7(%arg0: i32) -> (i32, i32) {
    %c0_i32 = arith.constant 0 : i32
    %c0_i32_0 = arith.constant 0 : i32
    %c0_i32_1 = arith.constant 0 : i32
    return %c0_i32, %c0_i32_0 : i32, i32
  }
  func.func @transform_8(%arg0: i32) -> (i32, i32) {
    %c0_i32 = arith.constant 0 : i32
    %c0_i32_0 = arith.constant 0 : i32
    %c0_i32_1 = arith.constant 0 : i32
    return %c0_i32, %c0_i32_0 : i32, i32
  }
  func.func @transform_9(%arg0: i32) -> (i32, i32, i32) {
    %c0_i32 = arith.constant 0 : i32
    %c0_i32_0 = arith.constant 0 : i32
    %c0_i32_1 = arith.constant 0 : i32
    return %arg0, %c0_i32, %c0_i32_0 : i32, i32, i32
  }
}

</mosaic_0001>

<bundles_post_ra>
// kernel: tpu_custom_call.1
= control target key start
LH: loop header
LB: loop body
LE: loop exit
PB: predicated region body
PF: predicated region fallthrough
CT: control target
= control target key end

     0   :  { %14 = vsyncpa [#allocation3], 0  ;;  %s3121_s0 = inlined_call_operand.vmem [shape: f32[2,16,256], index: 0, kind: input, shape index: {}]   ;;  %s3122_s1 = inlined_call_operand.hbm [shape: f32[3,256,256], index: 1, kind: input, shape index: {}]   ;;  %s3123_s2 = inlined_call_operand.vmem [shape: f32[1,256], index: 2, kind: input, shape index: {}]   ;;  %s3124_s3 = inlined_call_operand.hbm [shape: f32[3,256,256], index: 3, kind: input, shape index: {}]   ;;  %s3125_s4 = inlined_call_operand.vmem [shape: f32[1,256], index: 4, kind: input, shape index: {}]   ;;  %s3126_s5 = inlined_call_operand.vmem [shape: f32[256,4], index: 5, kind: input, shape index: {}]   ;;  %s3127_s6 = inlined_call_operand.vmem [shape: f32[1,4], index: 6, kind: input, shape index: {}]   ;;  %s3128_s7 = inlined_call_operand.vmem [shape: f32[4,256], index: 7, kind: input, shape index: {}]   ;;  %s3129_s8 = inlined_call_operand.vmem [shape: f32[1,256], index: 8, kind: input, shape index: {}]   ;;  %s3130_s9 = inlined_call_operand.hbm [shape: f32[2,16,256], index: 9, kind: output, shape index: {}]  }
   0x1   :  { %15 = vsyncpa [#allocation6], 0 }
   0x2   :  { %16 = vsyncpa [#allocation4], 0 }
   0x3   :  { %18 = vsyncpa [#allocation4 + $0x1], 0  ;;  %s2717_s30 = smov 0   ;;  %s2719_s10 = smov 0  }
   0x4   :  { %s2721_s11 = smov 0   ;;  %s2723_s12 = smov 0  }
   0x5 LB: > { %3137 = sst [smem:[#allocation11_spill]] %s2653_s11  ;;  %s2738_s13 = sadd.s32 4294967295, %s2657_s12   ;;  %s2657_s12 = sphi %s2723_s12, %s3151_s12   ;;  %s2653_s11 = sphi %s2721_s11, %s3153_s11   ;;  %s2649_s10 = sphi %s2719_s10, %s3155_s10   ;;  %s2645_s30 = sphi %s2717_s30, %s3154_s30  }
   0x6   : > { %s1939_s14 = sadd.s32 4294967294, %s2657_s12   ;;  %s2742_s15 = sadd.s32 1, %s2657_s12  }
   0x7   : > { %3138 = sst [smem:[#allocation12_spill]] %s2742_s15  ;;  %s225_s16 = sadd.s32 1, %s2653_s11 }
   0x8   : > { %s222_s17 = ssub.s32 %s2657_s12, %s2742_s15  ;;  %p235_p0 = scmp.ne.s32.totalorder %s2653_s11, %s2649_s10 }
   0x9   : > { %p223_p1 = scmp.eq.s32.totalorder %s222_s17, 0  ;;  %p236_p2 = scmp.eq.s32.totalorder %s2738_s13, 1 }
   0xa   : > { %p241_p3 = scmp.ne.s32.totalorder %s2649_s10, %s2645_s30  ;;  %p242_p4 = scmp.eq.s32.totalorder %s1939_s14, 1 }
   0xb   : > { %s2753_s18 = scalar_select %p223_p1, %s2653_s11, %s225_s16  }
   0xc   : > { %p2755_p5 = por %p236_p2, %p235_p0  ;;  %p2759_p6 = por %p242_p4, %p241_p3 }
   0xd   : > { %3139 = sst [smem:[#allocation13_spill]] %s2753_s18  ;;  %p1940_p7 = scmp.ge.s32.totalorder %s2657_s12, 1 }
   0xe   : > { %s3140_s19 = scalar_select %p2755_p5, 1, 0 }
   0xf   : > { %s3141_s20 = scalar_select %p2759_p6, 1, 0 }
  0x10   : > { %p249_p8 = scmp.lt.s32.totalorder %s2657_s12, 3  ;;  %p3131_p9 = scmp.eq.s32.totalorder %s2738_s13, 0 }
  0x11   : > { %s2659_s22 = smov [#allocation2]   ;;  %s2660_s25 = smov [#allocation5]  }
  0x12   : > { %p2766_p10 = pnand %p1940_p7, %p249_p8  ;;  %s261_s23 = sshll.u32 %s2659_s22, 4  ;;  %s262_s23 = int_to_ptr.vmem [resolvable:$true] %s261_s23 }
  0x13   : > { %s277_s26 = sshll.u32 %s2660_s25, 4  ;;  %s2531_s29 = scalar_lea.hbm %s3122_s1, 24576  ;;  %s2778_s26 = int_to_ptr.vmem [resolvable:$true] %s277_s26 }
  0x14   : > { %s3142_s21 = scalar_select %p2766_p10, 1, 0 }
  0x15   : > { %p2463_p11 = pneg %p2766_p10  ;;  %p2532_p13 = scmp.ne.s32.totalorder %s3122_s1, %s2531_s29 }
  0x16   : > { %p2538_p3 = scmp.lt.u32.totalorder %s2531_s29, %s3122_s1 }
  0x17   : > { %p2774_p12 = pnand %p3131_p9, %p2463_p11 }
  0x19   : > { %p2533_p0 = pneg %p2774_p12 }
  0x1b   : > { %p2534_p1 = pnand %p2533_p0, %p2532_p13 }
  0x1d   : > { %p2535_p2 = pneg %p2534_p1 }
  0x1f   : > { %p2540_p4 = pnand %p2538_p3, %p2535_p2 }
  0x21   : > { %2543 = shalt.err (!%p2540_p4)
}
  0x22   : > { %s2544_s25 = scalar_lea.vmem %s262_s23, 24576  ;;  %p2552_p9 = scmp.lt.s32.totalorder %s262_s23, %s262_s23 }
  0x23   : > { %p2545_p7 = scmp.ne.s32.totalorder %s262_s23, %s2544_s25  ;;  %p2553_p6 = scmp.lt.s32.totalorder %s2544_s25, %s2544_s25 }
  0x25   : > { %p2547_p8 = pnand %p2545_p7, %p2533_p0  ;;  %p2554_p5 = por %p2553_p6, %p2552_p9 }
  0x27   : > { %p2548_p11 = pneg %p2547_p8 }
  0x29   : > { %p2555_p10 = pnand %p2554_p5, %p2548_p11 }
  0x2b   : > { %2558 = shalt.err (!%p2555_p10)
}
  0x2c   : > { %s2661_s27 = smov 256   ;;  %s2662_s28 = smov 16  }
  0x2d   : > { %2466 = dma.hbm_to_vmem [thread:$0]  (!%p2774_p12), %s3122_s1, 24576, %s262_s23, [#allocation3], %s2661_s27, %s2661_s27, %s2662_s28  }
  0x2e   : > { %s2559_s22 = scalar_lea.hbm %s3124_s3, 24576 }
  0x2f   : > { %p2560_p13 = scmp.ne.s32.totalorder %s3124_s3, %s2559_s22  ;;  %p2566_p9 = scmp.lt.u32.totalorder %s2559_s22, %s3124_s3 }
  0x31   : > { %p2562_p5 = pnand %p2560_p13, %p2533_p0 }
  0x33   : > { %p2563_p6 = pneg %p2562_p5 }
  0x35   : > { %p2568_p10 = pnand %p2566_p9, %p2563_p6 }
  0x37   : > { %2571 = shalt.err (!%p2568_p10)
}
  0x38   : > { %s2572_s23 = scalar_lea.vmem %s2778_s26, 24576  ;;  %p2580_p4 = scmp.lt.s32.totalorder %s2778_s26, %s2778_s26 }
  0x39   : > { %p2573_p1 = scmp.ne.s32.totalorder %s2778_s26, %s2572_s23  ;;  %p2581_p7 = scmp.lt.s32.totalorder %s2572_s23, %s2572_s23 }
  0x3b   : > { %p2575_p2 = pnand %p2573_p1, %p2533_p0  ;;  %p2582_p8 = por %p2581_p7, %p2580_p4 }
  0x3d   : > { %p2576_p3 = pneg %p2575_p2 }
  0x3f   : > { %p2583_p11 = pnand %p2582_p8, %p2576_p3 }
  0x41   : > { %2586 = shalt.err (!%p2583_p11)
}
  0x42   : > { %2469 = dma.hbm_to_vmem [thread:$0]  (!%p2774_p12), %s3124_s3, 24576, %s2778_s26, [#allocation6], %s2661_s27, %s2661_s27, %s2662_s28  }
  0x43   : > { %p3144_p13 = scmp.ne.s32.totalorder %s3142_s21, 0 }
  0x44   : > { %p3145_p5 = scmp.eq.s32.totalorder (!%p3144_p13), %s2738_s13, 0 }
  0x45   : > { %316 = sbr.rel (%p3144_p13) target bundleno = 1592 (0x638), region = 56 }
  0x4c   : > { %2632 = dma.done.wait (%p3145_p5), [#allocation3], 24576   ;;  %p3146_p0 = pmov %p3145_p5 }
  0x4e   : > { %2634 = vsyncadd (%p3146_p0), [#allocation3], 4294942720  ;;  %p3147_p6 = pmov %p3146_p0 }
  0x4f   : > { %p3148_p9 = pmov %p3146_p0 }
  0x50   : > { %2636 = dma.done.wait (%p3147_p6), [#allocation6], 24576  }
  0x51   : > { %2638 = vsyncadd (%p3148_p9), [#allocation6], 4294942720  ;;  %p356_p10 = scmp.lt.s32.totalorder %s2738_s13, 1  ;;  %v365_v0 = vlaneseq  ;;  %v2663_v1 = vmov 0.0   ;;  %v614_v13 = vld [vmem:[#allocation2 + $0x208] sm:$0xff]  ;;  %v616_v14 = vld [vmem:[#allocation2 + $0x218] sm:$0xff] }
  0x52   : > { %452 = vmatprep.mubr.f32.mxu0 %v2663_v1  ;;  %535 = vmatprep.mubr.f32.mxu1 %v2663_v1  ;;  %v2013_v16 = vpack.c.bf16 %v616_v14, %v614_v13  ;;  %v613_v17 = vld [vmem:[#allocation2 + $0x200] sm:$0xff]  ;;  %v615_v18 = vld [vmem:[#allocation2 + $0x210] sm:$0xff]  ;;  %v618_v19 = vld [vmem:[#allocation2 + $0x228] sm:$0xff]  ;;  %vm381_vm2 = vcmask 130048   ;;  %vm1733_vm5 = vcmask 1043456   ;;  %vm1729_vm6 = vcmask 31744  }
  0x53   : > { %s357_s18 = scalar_select %p356_p10, %s2738_s13, 1  ;;  %v2841_v2 = vshrl.u32 %v365_v0, 7  ;;  %v369_v3 = vand.u32 127, %v365_v0  ;;  %v620_v20 = vld [vmem:[#allocation2 + $0x238] sm:$0xff]  ;;  %v2015_v23 = vpack.c.bf16 %v615_v18, %v613_v17  ;;  %v617_v25 = vld [vmem:[#allocation2 + $0x220] sm:$0xff]  ;;  %v619_v26 = vld [vmem:[#allocation2 + $0x230] sm:$0xff] }
  0x54   : > { %v2017_v24 = vpack.c.bf16 %v620_v20, %v618_v19  ;;  %v622_v27 = vld [vmem:[#allocation2 + $0x248] sm:$0xff]  ;;  %v624_v28 = vld [vmem:[#allocation2 + $0x258] sm:$0xff]  ;;  %v2019_v31 = vpack.c.bf16 %v619_v26, %v617_v25  ;;  %v621_v33 = vld [vmem:[#allocation2 + $0x240] sm:$0xff]  ;;  %s353_s17 = sand.u32 1, %s2649_s10   ;;  %s1969_s25 = sshll.u32 %s2738_s13, 9 }
  0x55   : > { %s1968_s21 = sshll.u32 %s357_s18, 5  ;;  %v370_v4 = vadd.s32 1, %v369_v3  ;;  %v375_v5 = vadd.s32 1, %v2841_v2  ;;  %v367_v6 = vadd.s32 8, %v2841_v2  ;;  %v2021_v32 = vpack.c.bf16 %v624_v28, %v622_v27  ;;  %v623_v34 = vld [vmem:[#allocation2 + $0x250] sm:$0xff]  ;;  %v626_v35 = vld [vmem:[#allocation2 + $0x268] sm:$0xff] }
  0x56   : > { %s2847_s27 = scalar_lea.vmem %s3121_s0, %s1968_s21  ;;  %v628_v36 = vld [vmem:[#allocation2 + $0x278] sm:$0xff]  ;;  %v2023_v37 = vpack.c.bf16 %v623_v34, %v621_v33  ;;  %v625_v39 = vld [vmem:[#allocation2 + $0x260] sm:$0xff]  ;;  %v627_v40 = vld [vmem:[#allocation2 + $0x270] sm:$0xff]  ;;  %s1947_s22 = sshll.u32 %s353_s17, 5 }
  0x57   : > { %v362_v7 = vld [vmem:[%s2847_s27 + $0x8] sm:$0xff]  ;;  %v2852_v8 = vld [vmem:[%s2847_s27 + $0x18] sm:$0xff]  ;;  %v2855_v9 = vld [vmem:[%s2847_s27] sm:$0xff]  ;;  %vm371_vm0 = vcmp.eq.s32.totalorder %v370_v4, %v2841_v2  ;;  %vm377_vm1 = vcmp.eq.s32.totalorder %v369_v3, %v375_v5  ;;  %v376_v12 = vadd.s32 1, %v367_v6  ;;  %vm372_vm3 = vcmp.eq.s32.totalorder %v370_v4, %v367_v6  ;;  %s355_s23 = scalar_lea.vmem [#allocation7], %s1947_s22  ;;  %s3074_s21 = scalar_lea.hbm %s3130_s9, %s1969_s25 }
  0x58   : > { %v2005_v10 = vpack.c.bf16 %v2852_v8, %v362_v7  ;;  %v2859_v11 = vld [vmem:[%s2847_s27 + $0x10] sm:$0xff]  ;;  %v2865_v21 = vsel %vm371_vm0, 1.0, %v2663_v1  ;;  %v2869_v22 = vsel %vm377_vm1, 1.0, %v2663_v1  ;;  %v2877_v29 = vsel %vm372_vm3, 1.0, %v2663_v1  ;;  %v630_v41 = vld [vmem:[#allocation2 + $0x288] sm:$0xff]  ;;  %v632_v42 = vld [vmem:[#allocation2 + $0x298] sm:$0xff] }
  0x59   : > { %v2007_v15 = vpack.c.bf16 %v2859_v11, %v2855_v9  ;;  %vm378_vm4 = vcmp.eq.s32.totalorder %v369_v3, %v376_v12  ;;  %v2025_v38 = vpack.c.bf16 %v628_v36, %v626_v35  ;;  %v2027_v43 = vpack.c.bf16 %v627_v40, %v625_v39  ;;  %v629_v45 = vld [vmem:[#allocation2 + $0x280] sm:$0xff]  ;;  %v631_v46 = vld [vmem:[#allocation2 + $0x290] sm:$0xff]  ;;  %v634_v47 = vld [vmem:[#allocation2 + $0x2a8] sm:$0xff]  ;;  %s1855_s11 = sshll.u32 %s355_s23, 4  ;;  %s3080_s13 = scalar_lea.sflag [#allocation4], %s353_s17  ;;  %s3076_s11 = int_to_ptr.vmem [resolvable:$true] %s1855_s11 }
  0x5a   : > { %2006 = vmatprep.subr.bf16.mxu0 %v2005_v10  ;;  %2010 = vmatprep.subr.bf16.mxu1 %v2005_v10  ;;  %v2881_v30 = vsel %vm378_vm4, 1.0, %v2663_v1  ;;  %v2029_v44 = vpack.c.bf16 %v632_v42, %v630_v41  ;;  %v636_v48 = vld [vmem:[#allocation2 + $0x2b8] sm:$0xff]  ;;  %v2031_v49 = vpack.c.bf16 %v631_v46, %v629_v45  ;;  %v633_v51 = vld [vmem:[#allocation2 + $0x2a0] sm:$0xff]  ;;  %v635_v52 = vld [vmem:[#allocation2 + $0x2b0] sm:$0xff]  ;;  %s2587_s24 = scalar_lea.vmem %s3076_s11, 512  ;;  %p3149_p1 = scmp.ne.s32.totalorder %s3140_s19, 0 }
  0x5b   : > { %2008 = vmatpush1.bf16.msra.mxu0 %v2007_v15  ;;  %2012 = vmatpush1.bf16.msra.mxu1 %v2007_v15  ;;  %v2033_v50 = vpack.c.bf16 %v636_v48, %v634_v47  ;;  %v638_v53 = vld [vmem:[#allocation2 + $0x2c8] sm:$0xff]  ;;  %v640_v54 = vld [vmem:[#allocation2 + $0x2d8] sm:$0xff]  ;;  %v2035_v55 = vpack.c.bf16 %v635_v52, %v633_v51  ;;  %v637_v57 = vld [vmem:[#allocation2 + $0x2c0] sm:$0xff]  ;;  %p2588_p12 = scmp.ne.s32.totalorder %s3076_s11, %s2587_s24  ;;  %s2664_s26 = smov [#allocation7]  }
  0x5c   : > { %2014 = vmatprep.subr.bf16.mxu0 %v2013_v16  ;;  %v2037_v56 = vpack.c.bf16 %v640_v54, %v638_v53  ;;  %v639_v58 = vld [vmem:[#allocation2 + $0x2d0] sm:$0xff]  ;;  %v642_v59 = vld [vmem:[#allocation2 + $0x2e8] sm:$0xff]  ;;  %v644_v60 = vld [vmem:[#allocation2 + $0x2f8] sm:$0xff]  ;;  %s2591_s28 = sshll.u32 %s2664_s26, 4  ;;  %s2592_s28 = int_to_ptr.vmem [resolvable:$false] %s2591_s28 }
  0x5d   : > { %v2039_v61 = vpack.c.bf16 %v639_v58, %v637_v57  ;;  %v2041_v62 = vpack.c.bf16 %v644_v60, %v642_v59  ;;  %v641_v63 = vld [vmem:[#allocation2 + $0x2e0] sm:$0xff]  ;;  %v643_v0 = vld [vmem:[#allocation2 + $0x2f0] sm:$0xff]  ;;  %v646_v3 = vld [vmem:[#allocation2 + $0x308] sm:$0xff]  ;;  %p2589_p2 = pnand %p2588_p12, %p3149_p1  ;;  %s2593_s29 = scalar_lea.vmem %s2592_s28, 1024 }
  0x5e   : > { %1950 = vmatmul.mubr.msk.f32.vlgmr.msra.gmra.mrb[0].mxu0 %vm381_vm2, %v2865_v21  ;;  %1952 = vmatmul.mubr.msk.f32.vlgmr.msra.gmra.mrb[0].mxu1 %vm381_vm2, %v2869_v22  ;;  %v648_v4 = vld [vmem:[#allocation2 + $0x318] sm:$0xff]  ;;  %v2043_v5 = vpack.c.bf16 %v643_v0, %v641_v63  ;;  %v647_v10 = vld [vmem:[#allocation2 + $0x310] sm:$0xff]  ;;  %v650_v12 = vld [vmem:[#allocation2 + $0x328] sm:$0xff]  ;;  %p2594_p4 = scmp.lt.s32.totalorder %s3076_s11, %s2592_s28  ;;  %p2595_p7 = scmp.lt.s32.totalorder %s2593_s29, %s2587_s24 }
  0x5f   : > { %458 = vmatprep.mubr.f32.mxu0 %v2663_v1  ;;  %541 = vmatprep.mubr.f32.mxu1 %v2663_v1  ;;  %v2045_v6 = vpack.c.bf16 %v648_v4, %v646_v3  ;;  %v652_v13 = vld [vmem:[#allocation2 + $0x338] sm:$0xff]  ;;  %v649_v16 = vld [vmem:[#allocation2 + $0x320] sm:$0xff]  ;;  %v651_v17 = vld [vmem:[#allocation2 + $0x330] sm:$0xff]  ;;  %p2590_p3 = pneg %p2589_p2 }
  0x60   : > { %2016 = vmatpush1.bf16.msra.mxu0 %v2015_v23  ;;  %v2049_v15 = vpack.c.bf16 %v652_v13, %v650_v12  ;;  %v654_v18 = vld [vmem:[#allocation2 + $0x348] sm:$0xff]  ;;  %v656_v19 = vld [vmem:[#allocation2 + $0x358] sm:$0xff]  ;;  %v2051_v20 = vpack.c.bf16 %v651_v17, %v649_v16  ;;  %v655_v25 = vld [vmem:[#allocation2 + $0x350] sm:$0xff]  ;;  %p2596_p8 = por %p2595_p7, %p2594_p4 }
  0x61   : > { %2018 = vmatprep.subr.bf16.mxu0 %v2017_v24  ;;  %v2053_v23 = vpack.c.bf16 %v656_v19, %v654_v18  ;;  %v653_v24 = vld [vmem:[#allocation2 + $0x340] sm:$0xff]  ;;  %v658_v26 = vld [vmem:[#allocation2 + $0x368] sm:$0xff]  ;;  %v660_v27 = vld [vmem:[#allocation2 + $0x378] sm:$0xff] }
  0x62   : > { %1951 = vmatmul.mubr.msk.f32.gmra.mrb[2].mxu0 %vm381_vm2, %v2877_v29  ;;  %1953 = vmatmul.mubr.msk.f32.gmra.mrb[2].mxu1 %vm381_vm2, %v2881_v30  ;;  %v2055_v28 = vpack.c.bf16 %v655_v25, %v653_v24  ;;  %v659_v33 = vld [vmem:[#allocation2 + $0x370] sm:$0xff]  ;;  %v662_v34 = vld [vmem:[#allocation2 + $0x388] sm:$0xff]  ;;  %v664_v35 = vld [vmem:[#allocation2 + $0x398] sm:$0xff]  ;;  %p2597_p11 = pnand %p2596_p8, %p2590_p3 }
  0x63   : > { %741 = vmatprep.mubr.f32.mxu0 %v362_v7  ;;  %1061 = vmatprep.mubr.f32.mxu1 %v2663_v1  ;;  %v645_v7 = vld [vmem:[#allocation2 + $0x300] sm:$0xff]  ;;  %v663_v39 = vld [vmem:[#allocation2 + $0x390] sm:$0xff]  ;;  %v666_v40 = vld [vmem:[#allocation2 + $0x3a8] sm:$0xff] }
  0x64   : > { %2020 = vmatpush1.bf16.msra.mxu0 %v2019_v31  ;;  %v2047_v14 = vpack.c.bf16 %v647_v10, %v645_v7  ;;  %v2057_v31 = vpack.c.bf16 %v660_v27, %v658_v26  ;;  %v668_v41 = vld [vmem:[#allocation2 + $0x3b8] sm:$0xff]  ;;  %v667_v45 = vld [vmem:[#allocation2 + $0x3b0] sm:$0xff]  ;;  %v670_v46 = vld [vmem:[#allocation2 + $0x3c8] sm:$0xff] }
  0x65   : > { %2022 = vmatprep.subr.bf16.mxu0 %v2021_v32  ;;  %v657_v32 = vld [vmem:[#allocation2 + $0x360] sm:$0xff]  ;;  %v672_v47 = vld [vmem:[#allocation2 + $0x3d8] sm:$0xff]  ;;  %v671_v51 = vld [vmem:[#allocation2 + $0x3d0] sm:$0xff] }
  0x66   : > { %v2059_v36 = vpack.c.bf16 %v659_v33, %v657_v32  ;;  %v674_v52 = vld [vmem:[#allocation2 + $0x3e8] sm:$0xff]  ;;  %v676_v53 = vld [vmem:[#allocation2 + $0x3f8] sm:$0xff]  ;;  %v675_v57 = vld [vmem:[#allocation2 + $0x3f0] sm:$0xff] }
  0x67   : > { %v549_v58 = vld [vmem:[#allocation2 + $0x8] sm:$0xff]  ;;  %v551_v59 = vld [vmem:[#allocation2 + $0x18] sm:$0xff]  ;;  %v550_v63 = vld [vmem:[#allocation2 + $0x10] sm:$0xff] }
  0x68   : > { %2024 = vmatpush1.bf16.msra.mxu0 %v2023_v37  ;;  %v2061_v37 = vpack.c.bf16 %v664_v35, %v662_v34  ;;  %v553_v0 = vld [vmem:[#allocation2 + $0x28] sm:$0xff]  ;;  %v555_v3 = vld [vmem:[#allocation2 + $0x38] sm:$0xff]  ;;  %v554_v7 = vld [vmem:[#allocation2 + $0x30] sm:$0xff] }
  0x69   : > { %2026 = vmatprep.subr.bf16.mxu0 %v2025_v38  ;;  %v661_v38 = vld [vmem:[#allocation2 + $0x380] sm:$0xff]  ;;  %v557_v10 = vld [vmem:[#allocation2 + $0x48] sm:$0xff]  ;;  %v559_v12 = vld [vmem:[#allocation2 + $0x58] sm:$0xff] }
  0x6a   : > { %v2063_v42 = vpack.c.bf16 %v663_v39, %v661_v38  ;;  %v558_v16 = vld [vmem:[#allocation2 + $0x50] sm:$0xff]  ;;  %v561_v17 = vld [vmem:[#allocation2 + $0x68] sm:$0xff]  ;;  %v563_v18 = vld [vmem:[#allocation2 + $0x78] sm:$0xff] }
  0x6b   : > { %v562_v24 = vld [vmem:[#allocation2 + $0x70] sm:$0xff]  ;;  %v565_v25 = vld [vmem:[#allocation2 + $0x88] sm:$0xff]  ;;  %v564_v27 = vld [vmem:[#allocation2 + $0x80] sm:$0xff] }
  0x6c   : > { %2028 = vmatpush1.bf16.msra.mxu0 %v2027_v43  ;;  %v2065_v43 = vpack.c.bf16 %v668_v41, %v666_v40  ;;  %v571_v32 = vld [vmem:[#allocation2 + $0xb8] sm:$0xff]  ;;  %v568_v34 = vld [vmem:[#allocation2 + $0xa0] sm:$0xff]  ;;  %v570_v35 = vld [vmem:[#allocation2 + $0xb0] sm:$0xff] }
  0x6d   : > { %2030 = vmatprep.subr.bf16.mxu0 %v2029_v44  ;;  %v665_v44 = vld [vmem:[#allocation2 + $0x3a0] sm:$0xff]  ;;  %v2099_v38 = vpack.c.bf16 %v570_v35, %v568_v34  ;;  %v574_v41 = vld [vmem:[#allocation2 + $0xd0] sm:$0xff] }
  0x6e   : > { %v2067_v48 = vpack.c.bf16 %v667_v45, %v665_v44  ;;  %v572_v40 = vld [vmem:[#allocation2 + $0xc0] sm:$0xff] }
  0x6f   : > { %v2103_v44 = vpack.c.bf16 %v574_v41, %v572_v40 }
  0x70   : > { %2032 = vmatpush1.bf16.msra.mxu0 %v2031_v49  ;;  %v2069_v49 = vpack.c.bf16 %v672_v47, %v670_v46  ;;  %v576_v46 = vld [vmem:[#allocation2 + $0xe0] sm:$0xff]  ;;  %v578_v47 = vld [vmem:[#allocation2 + $0xf0] sm:$0xff] }
  0x71   : > { %2034 = vmatprep.subr.bf16.mxu0 %v2033_v50  ;;  %v669_v50 = vld [vmem:[#allocation2 + $0x3c0] sm:$0xff] }
  0x72   : > { %v2071_v54 = vpack.c.bf16 %v671_v51, %v669_v50  ;;  %v2107_v50 = vpack.c.bf16 %v578_v47, %v576_v46 }
  0x74   : > { %2036 = vmatpush1.bf16.msra.mxu0 %v2035_v55  ;;  %v2073_v55 = vpack.c.bf16 %v676_v53, %v674_v52  ;;  %v580_v52 = vld [vmem:[#allocation2 + $0x100] sm:$0xff]  ;;  %v582_v53 = vld [vmem:[#allocation2 + $0x110] sm:$0xff] }
  0x75   : > { %2038 = vmatprep.subr.bf16.mxu0 %v2037_v56  ;;  %v673_v56 = vld [vmem:[#allocation2 + $0x3e0] sm:$0xff] }
  0x76   : > { %v2075_v60 = vpack.c.bf16 %v675_v57, %v673_v56  ;;  %v2111_v56 = vpack.c.bf16 %v582_v53, %v580_v52  ;;  %v838_v52 = vld [vmem:[#allocation2 + $0x430] sm:$0xff] }
  0x78   : > { %2040 = vmatpush1.bf16.msra.mxu0 %v2039_v61  ;;  %v2077_v61 = vpack.c.bf16 %v551_v59, %v549_v58  ;;  %v584_v58 = vld [vmem:[#allocation2 + $0x120] sm:$0xff]  ;;  %v586_v59 = vld [vmem:[#allocation2 + $0x130] sm:$0xff] }
  0x79   : > { %2042 = vmatprep.subr.bf16.mxu0 %v2041_v62  ;;  %v548_v62 = vld [vmem:[#allocation2] sm:$0xff] }
  0x7a   : > { %v2079_v4 = vpack.c.bf16 %v550_v63, %v548_v62  ;;  %v2115_v62 = vpack.c.bf16 %v586_v59, %v584_v58 }
  0x7c   : > { %2044 = vmatpush1.bf16.msra.mxu0 %v2043_v5  ;;  %v2081_v5 = vpack.c.bf16 %v555_v3, %v553_v0  ;;  %v588_v0 = vld [vmem:[#allocation2 + $0x140] sm:$0xff]  ;;  %v590_v3 = vld [vmem:[#allocation2 + $0x150] sm:$0xff] }
  0x7d   : > { %2046 = vmatprep.subr.bf16.mxu0 %v2045_v6  ;;  %v552_v6 = vld [vmem:[#allocation2 + $0x20] sm:$0xff] }
  0x7e   : > { %v2083_v13 = vpack.c.bf16 %v554_v7, %v552_v6  ;;  %v2119_v6 = vpack.c.bf16 %v590_v3, %v588_v0  ;;  %v845_v0 = vld [vmem:[#allocation2 + $0x468] sm:$0xff]  ;;  %v847_v3 = vld [vmem:[#allocation2 + $0x478] sm:$0xff] }
  0x80   : > { %2048 = vmatpush1.bf16.msra.mxu0 %v2047_v14  ;;  %v2085_v14 = vpack.c.bf16 %v559_v12, %v557_v10  ;;  %v592_v10 = vld [vmem:[#allocation2 + $0x160] sm:$0xff]  ;;  %v594_v12 = vld [vmem:[#allocation2 + $0x170] sm:$0xff] }
  0x81   : > { %2050 = vmatprep.subr.bf16.mxu0 %v2049_v15  ;;  %v556_v15 = vld [vmem:[#allocation2 + $0x40] sm:$0xff] }
  0x82   : > { %v2087_v19 = vpack.c.bf16 %v558_v16, %v556_v15  ;;  %v2123_v15 = vpack.c.bf16 %v594_v12, %v592_v10  ;;  %v849_v10 = vld [vmem:[#allocation2 + $0x488] sm:$0xff]  ;;  %v851_v12 = vld [vmem:[#allocation2 + $0x498] sm:$0xff] }
  0x84   : > { %2052 = vmatpush1.bf16.msra.mxu0 %v2051_v20  ;;  %v2089_v20 = vpack.c.bf16 %v563_v18, %v561_v17  ;;  %v596_v17 = vld [vmem:[#allocation2 + $0x180] sm:$0xff]  ;;  %v598_v18 = vld [vmem:[#allocation2 + $0x190] sm:$0xff] }
  0x85   : > { %2054 = vmatprep.subr.bf16.mxu0 %v2053_v23  ;;  %v560_v23 = vld [vmem:[#allocation2 + $0x60] sm:$0xff] }
  0x86   : > { %v2091_v26 = vpack.c.bf16 %v562_v24, %v560_v23  ;;  %v2127_v23 = vpack.c.bf16 %v598_v18, %v596_v17  ;;  %v853_v17 = vld [vmem:[#allocation2 + $0x4a8] sm:$0xff]  ;;  %v855_v18 = vld [vmem:[#allocation2 + $0x4b8] sm:$0xff] }
  0x88   : > { %2056 = vmatpush1.bf16.msra.mxu0 %v2055_v28  ;;  %v566_v28 = vld [vmem:[#allocation2 + $0x90] sm:$0xff] }
  0x89   : > { %2058 = vmatprep.subr.bf16.mxu0 %v2057_v31  ;;  %v569_v31 = vld [vmem:[#allocation2 + $0xa8] sm:$0xff]  ;;  %v2095_v33 = vpack.c.bf16 %v566_v28, %v564_v27 }
  0x8c   : > { %2060 = vmatpush1.bf16.msra.mxu0 %v2059_v36  ;;  %v573_v36 = vld [vmem:[#allocation2 + $0xc8] sm:$0xff] }
  0x8d   : > { %2062 = vmatprep.subr.bf16.mxu0 %v2061_v37  ;;  %v575_v37 = vld [vmem:[#allocation2 + $0xd8] sm:$0xff] }
  0x8e   : > { %v2101_v39 = vpack.c.bf16 %v575_v37, %v573_v36  ;;  %v608_v36 = vld [vmem:[#allocation2 + $0x1e0] sm:$0xff]  ;;  %v610_v37 = vld [vmem:[#allocation2 + $0x1f0] sm:$0xff] }
  0x8f   : > { %v2139_v40 = vpack.c.bf16 %v610_v37, %v608_v36  ;;  %v865_v36 = vld [vmem:[#allocation2 + $0x508] sm:$0xff]  ;;  %v867_v37 = vld [vmem:[#allocation2 + $0x518] sm:$0xff] }
  0x90   : > { %2064 = vmatpush1.bf16.msra.mxu0 %v2063_v42  ;;  %v577_v42 = vld [vmem:[#allocation2 + $0xe8] sm:$0xff] }
  0x91   : > { %2066 = vmatprep.subr.bf16.mxu0 %v2065_v43  ;;  %v579_v43 = vld [vmem:[#allocation2 + $0xf8] sm:$0xff] }
  0x92   : > { %v2105_v45 = vpack.c.bf16 %v579_v43, %v577_v42  ;;  %v832_v42 = vld [vmem:[#allocation2 + $0x400] sm:$0xff]  ;;  %v834_v43 = vld [vmem:[#allocation2 + $0x410] sm:$0xff] }
  0x93   : > { %v2143_v47 = vpack.c.bf16 %v834_v43, %v832_v42  ;;  %v869_v42 = vld [vmem:[#allocation2 + $0x528] sm:$0xff]  ;;  %v871_v43 = vld [vmem:[#allocation2 + $0x538] sm:$0xff] }
  0x94   : > { %2068 = vmatpush1.bf16.msra.mxu0 %v2067_v48  ;;  %v581_v48 = vld [vmem:[#allocation2 + $0x108] sm:$0xff] }
  0x95   : > { %2070 = vmatprep.subr.bf16.mxu0 %v2069_v49  ;;  %v583_v49 = vld [vmem:[#allocation2 + $0x118] sm:$0xff] }
  0x96   : > { %v2109_v51 = vpack.c.bf16 %v583_v49, %v581_v48 }
  0x98   : > { %2072 = vmatpush1.bf16.msra.mxu0 %v2071_v54  ;;  %v585_v54 = vld [vmem:[#allocation2 + $0x128] sm:$0xff] }
  0x99   : > { %2074 = vmatprep.subr.bf16.mxu0 %v2073_v55  ;;  %v587_v55 = vld [vmem:[#allocation2 + $0x138] sm:$0xff] }
  0x9a   : > { %v2113_v57 = vpack.c.bf16 %v587_v55, %v585_v54  ;;  %v841_v54 = vld [vmem:[#allocation2 + $0x448] sm:$0xff]  ;;  %v843_v55 = vld [vmem:[#allocation2 + $0x458] sm:$0xff] }
  0x9b   : > { %v2149_v59 = vpack.c.bf16 %v843_v55, %v841_v54  ;;  %v874_v54 = vld [vmem:[#allocation2 + $0x550] sm:$0xff]  ;;  %v877_v55 = vld [vmem:[#allocation2 + $0x568] sm:$0xff] }
  0x9c   : > { %2076 = vmatpush1.bf16.msra.mxu0 %v2075_v60  ;;  %v589_v60 = vld [vmem:[#allocation2 + $0x148] sm:$0xff] }
  0x9d   : > { %2078 = vmatprep.subr.bf16.mxu0 %v2077_v61  ;;  %v591_v61 = vld [vmem:[#allocation2 + $0x158] sm:$0xff] }
  0x9e   : > { %v2117_v63 = vpack.c.bf16 %v591_v61, %v589_v60  ;;  %v840_v60 = vld [vmem:[#allocation2 + $0x440] sm:$0xff]  ;;  %v842_v61 = vld [vmem:[#allocation2 + $0x450] sm:$0xff] }
  0x9f   : > { %742 = vmatmul.mubr.f32.vlgmr.msra.gmra.mrb[4].mxu0 %v2855_v9  ;;  %v567_v9 = vld [vmem:[#allocation2 + $0x98] sm:$0xff] }
  0xa0   : > { %2080 = vmatpush1.bf16.msra.mxu0 %v2079_v4  ;;  %747 = vmatprep.mubr.f32.mxu0 %v2852_v8  ;;  %v2093_v8 = vpack.c.bf16 %v567_v9, %v565_v25  ;;  %v593_v4 = vld [vmem:[#allocation2 + $0x168] sm:$0xff]  ;;  %v600_v25 = vld [vmem:[#allocation2 + $0x1a0] sm:$0xff]  ;;  %v602_v9 = vld [vmem:[#allocation2 + $0x1b0] sm:$0xff] }
  0xa1   : > { %2082 = vmatprep.subr.bf16.mxu0 %v2081_v5  ;;  %v595_v5 = vld [vmem:[#allocation2 + $0x178] sm:$0xff]  ;;  %v2131_v27 = vpack.c.bf16 %v602_v9, %v600_v25  ;;  %v857_v25 = vld [vmem:[#allocation2 + $0x4c8] sm:$0xff] }
  0xa2   : > { %v2121_v7 = vpack.c.bf16 %v595_v5, %v593_v4  ;;  %v2151_v4 = vpack.c.bf16 %v842_v61, %v840_v60  ;;  %v2153_v5 = vpack.c.bf16 %v847_v3, %v845_v0  ;;  %v859_v9 = vld [vmem:[#allocation2 + $0x4d8] sm:$0xff]  ;;  %v876_v60 = vld [vmem:[#allocation2 + $0x560] sm:$0xff]  ;;  %v878_v61 = vld [vmem:[#allocation2 + $0x570] sm:$0xff] }
  0xa3   : > { %748 = vmatmul.mubr.f32.gmra.mrb[6].mxu0 %v2859_v11  ;;  %v2097_v11 = vpack.c.bf16 %v571_v32, %v569_v31  ;;  %v604_v31 = vld [vmem:[#allocation2 + $0x1c0] sm:$0xff]  ;;  %v606_v32 = vld [vmem:[#allocation2 + $0x1d0] sm:$0xff]  ;;  %v883_v0 = vld [vmem:[#allocation2 + $0x598] sm:$0xff]  ;;  %v2187_v3 = vpack.c.bf16 %v878_v61, %v876_v60 }
  0xa4   : > { %2084 = vmatpush1.bf16.msra.mxu0 %v2083_v13  ;;  %v597_v13 = vld [vmem:[#allocation2 + $0x188] sm:$0xff]  ;;  %v2135_v34 = vpack.c.bf16 %v606_v32, %v604_v31  ;;  %v863_v32 = vld [vmem:[#allocation2 + $0x4f8] sm:$0xff]  ;;  %v1224_v61 = vld [vmem:[#allocation5 + $0x240] sm:$0xff] }
  0xa5   : > { %2086 = vmatprep.subr.bf16.mxu0 %v2085_v14  ;;  %v599_v14 = vld [vmem:[#allocation2 + $0x198] sm:$0xff]  ;;  %v861_v31 = vld [vmem:[#allocation2 + $0x4e8] sm:$0xff] }
  0xa6   : > { %v2125_v16 = vpack.c.bf16 %v599_v14, %v597_v13  ;;  %v2157_v14 = vpack.c.bf16 %v851_v12, %v849_v10  ;;  %v887_v10 = vld [vmem:[#allocation2 + $0x5b8] sm:$0xff] }
  0xa8   : > { %2088 = vmatpush1.bf16.msra.mxu0 %v2087_v19  ;;  %v601_v19 = vld [vmem:[#allocation2 + $0x1a8] sm:$0xff] }
  0xa9   : > { %2090 = vmatprep.subr.bf16.mxu0 %v2089_v20  ;;  %v603_v20 = vld [vmem:[#allocation2 + $0x1b8] sm:$0xff] }
  0xaa   : > { %v2129_v24 = vpack.c.bf16 %v603_v20, %v601_v19  ;;  %v2161_v20 = vpack.c.bf16 %v855_v18, %v853_v17  ;;  %v891_v17 = vld [vmem:[#allocation2 + $0x5d8] sm:$0xff] }
  0xac   : > { %2092 = vmatpush1.bf16.msra.mxu0 %v2091_v26  ;;  %v605_v26 = vld [vmem:[#allocation2 + $0x1c8] sm:$0xff] }
  0xad   : > { %2094 = vmatprep.subr.bf16.mxu0 %v2093_v8  ;;  %v607_v8 = vld [vmem:[#allocation2 + $0x1d8] sm:$0xff] }
  0xae   : > { %v2133_v28 = vpack.c.bf16 %v607_v8, %v605_v26  ;;  %v2165_v8 = vpack.c.bf16 %v859_v9, %v857_v25  ;;  %v895_v25 = vld [vmem:[#allocation2 + $0x5f8] sm:$0xff] }
  0xb0   : > { %2096 = vmatpush1.bf16.msra.mxu0 %v2095_v33  ;;  %v609_v33 = vld [vmem:[#allocation2 + $0x1e8] sm:$0xff] }
  0xb1   : > { %2098 = vmatprep.subr.bf16.mxu0 %v2097_v11  ;;  %v611_v11 = vld [vmem:[#allocation2 + $0x1f8] sm:$0xff] }
  0xb2   : > { %v2137_v35 = vpack.c.bf16 %v611_v11, %v609_v33  ;;  %v2169_v11 = vpack.c.bf16 %v863_v32, %v861_v31  ;;  %v2901_v31 = vsub.s32 1, %v2841_v2  ;;  %v977_v32 = vld [vmem:[%s3123_s2] sm:$0x3] }
  0xb4   : > { %2100 = vmatpush1.bf16.msra.mxu0 %v2099_v38  ;;  %v833_v38 = vld [vmem:[#allocation2 + $0x408] sm:$0xff] }
  0xb5   : > { %2102 = vmatprep.subr.bf16.mxu0 %v2101_v39  ;;  %v835_v39 = vld [vmem:[#allocation2 + $0x418] sm:$0xff] }
  0xb6   : > { %v2141_v41 = vpack.c.bf16 %v835_v39, %v833_v38  ;;  %v2173_v39 = vpack.c.bf16 %v867_v37, %v865_v36 }
  0xb8   : > { %2104 = vmatpush1.bf16.msra.mxu0 %v2103_v44  ;;  %v837_v44 = vld [vmem:[#allocation2 + $0x428] sm:$0xff] }
  0xb9   : > { %2106 = vmatprep.subr.bf16.mxu0 %v2105_v45  ;;  %v839_v45 = vld [vmem:[#allocation2 + $0x438] sm:$0xff] }
  0xbc   : > { %2108 = vmatpush1.bf16.msra.mxu0 %v2107_v50  ;;  %v2145_v50 = vpack.c.bf16 %v839_v45, %v837_v44  ;;  %v2177_v45 = vpack.c.bf16 %v871_v43, %v869_v42 }
  0xbd   : > { %2110 = vmatprep.subr.bf16.mxu0 %v2109_v51  ;;  %v836_v51 = vld [vmem:[#allocation2 + $0x420] sm:$0xff] }
  0xc0   : > { %2112 = vmatpush1.bf16.msra.mxu0 %v2111_v56  ;;  %v2147_v56 = vpack.c.bf16 %v838_v52, %v836_v51 }
  0xc1   : > { %2114 = vmatprep.subr.bf16.mxu0 %v2113_v57 }
  0xc4   : > { %2116 = vmatpush1.bf16.msra.mxu0 %v2115_v62 }
  0xc5   : > { %2118 = vmatprep.subr.bf16.mxu0 %v2117_v63 }
  0xc8   : > { %2120 = vmatpush1.bf16.msra.mxu0 %v2119_v6  ;;  %v844_v6 = vld [vmem:[#allocation2 + $0x460] sm:$0xff] }
  0xc9   : > { %2122 = vmatprep.subr.bf16.mxu0 %v2121_v7  ;;  %v846_v7 = vld [vmem:[#allocation2 + $0x470] sm:$0xff] }
  0xca   : > { %v2155_v13 = vpack.c.bf16 %v846_v7, %v844_v6  ;;  %v882_v6 = vld [vmem:[#allocation2 + $0x590] sm:$0xff]  ;;  %v885_v7 = vld [vmem:[#allocation2 + $0x5a8] sm:$0xff] }
  0xcc   : > { %2124 = vmatpush1.bf16.msra.mxu0 %v2123_v15  ;;  %v848_v15 = vld [vmem:[#allocation2 + $0x480] sm:$0xff] }
  0xcd   : > { %2126 = vmatprep.subr.bf16.mxu0 %v2125_v16  ;;  %v850_v16 = vld [vmem:[#allocation2 + $0x490] sm:$0xff] }
  0xce   : > { %v2159_v19 = vpack.c.bf16 %v850_v16, %v848_v15  ;;  %v886_v15 = vld [vmem:[#allocation2 + $0x5b0] sm:$0xff]  ;;  %v889_v16 = vld [vmem:[#allocation2 + $0x5c8] sm:$0xff] }
  0xd0   : > { %2128 = vmatpush1.bf16.msra.mxu0 %v2127_v23  ;;  %v852_v23 = vld [vmem:[#allocation2 + $0x4a0] sm:$0xff] }
  0xd1   : > { %2130 = vmatprep.subr.bf16.mxu0 %v2129_v24  ;;  %v854_v24 = vld [vmem:[#allocation2 + $0x4b0] sm:$0xff] }
  0xd2   : > { %v2163_v26 = vpack.c.bf16 %v854_v24, %v852_v23  ;;  %v890_v23 = vld [vmem:[#allocation2 + $0x5d0] sm:$0xff]  ;;  %v893_v24 = vld [vmem:[#allocation2 + $0x5e8] sm:$0xff] }
  0xd4   : > { %2132 = vmatpush1.bf16.msra.mxu0 %v2131_v27  ;;  %v856_v27 = vld [vmem:[#allocation2 + $0x4c0] sm:$0xff] }
  0xd5   : > { %2134 = vmatprep.subr.bf16.mxu0 %v2133_v28  ;;  %v858_v28 = vld [vmem:[#allocation2 + $0x4d0] sm:$0xff] }
  0xd6   : > { %v2167_v33 = vpack.c.bf16 %v858_v28, %v856_v27  ;;  %v894_v27 = vld [vmem:[#allocation2 + $0x5f0] sm:$0xff] }
  0xd8   : > { %2136 = vmatpush1.bf16.msra.mxu0 %v2135_v34  ;;  %v860_v34 = vld [vmem:[#allocation2 + $0x4e0] sm:$0xff] }
  0xd9   : > { %2138 = vmatprep.subr.bf16.mxu0 %v2137_v35  ;;  %v862_v35 = vld [vmem:[#allocation2 + $0x4f0] sm:$0xff] }
  0xda   : > { %v2171_v38 = vpack.c.bf16 %v862_v35, %v860_v34  ;;  %v986_v34 = vrot.slane %v977_v32, %v2901_v31 }
  0xdc   : > { %2140 = vmatpush1.bf16.msra.mxu0 %v2139_v40  ;;  %v864_v40 = vld [vmem:[#allocation2 + $0x500] sm:$0xff] }
  0xdd   : > { %2142 = vmatprep.subr.bf16.mxu0 %v2141_v41  ;;  %v866_v41 = vld [vmem:[#allocation2 + $0x510] sm:$0xff] }
  0xde   : > { %v2175_v44 = vpack.c.bf16 %v866_v41, %v864_v40 }
 0x131   : > { %v454_v46 = vpop.f32.mrb[0].mxu0  ;;  %v2891_v48 = vpop.f32.mrb[0].mxu1 }
 0x132   : > { %v456_v49 = vpop.f32.mrb[1].mxu0  ;;  %v539_v53 = vpop.f32.mrb[1].mxu1 }
 0x133   : > { %818 = vmatprep.mubr.f32.mxu0 %v456_v49  ;;  %v873_v49 = vld [vmem:[#allocation2 + $0x548] sm:$0xff] }
 0x134   : > { %819 = vmatmul.mubr.f32.vlgmr.msra.gmra.mrb[4].mxu0 %v454_v46  ;;  %v868_v46 = vld [vmem:[#allocation2 + $0x520] sm:$0xff] }
 0x135   : > { %2144 = vmatpush1.bf16.msra.mxu0 %v2143_v47  ;;  %v460_v57 = vpop.f32.mrb[2].mxu0  ;;  %v2893_v58 = vpop.f32.mrb[2].mxu1  ;;  %v870_v47 = vld [vmem:[#allocation2 + $0x530] sm:$0xff] }
 0x136   : > { %2146 = vmatprep.subr.bf16.mxu0 %v2145_v50  ;;  %v462_v62 = vpop.f32.mrb[3].mxu0  ;;  %v2895_v63 = vpop.f32.mrb[3].mxu1  ;;  %v875_v50 = vld [vmem:[#allocation2 + $0x558] sm:$0xff]  ;;  %v2179_v51 = vpack.c.bf16 %v870_v47, %v868_v46 }
 0x137   : > { %824 = vmatprep.mubr.f32.mxu0 %v462_v62  ;;  %v2181_v52 = vpack.c.bf16 %v875_v50, %v873_v49  ;;  %v881_v62 = vld [vmem:[#allocation2 + $0x588] sm:$0xff]  ;;  %v1219_v46 = vld [vmem:[#allocation5 + $0x218] sm:$0xff]  ;;  %v1216_v49 = vld [vmem:[#allocation5 + $0x200] sm:$0xff] }
 0x138   : > { %825 = vmatmul.mubr.f32.gmra.mrb[6].mxu0 %v460_v57  ;;  %v1218_v50 = vld [vmem:[#allocation5 + $0x210] sm:$0xff] }
 0x139   : > { %2148 = vmatpush1.bf16.msra.mxu0 %v2147_v56  ;;  %960 = vmatprep.mubr.f32.mxu0 %v539_v53  ;;  %v872_v53 = vld [vmem:[#allocation2 + $0x540] sm:$0xff]  ;;  %v879_v56 = vld [vmem:[#allocation2 + $0x578] sm:$0xff] }
 0x13a   : > { %2150 = vmatprep.subr.bf16.mxu0 %v2149_v59  ;;  %v2183_v57 = vpack.c.bf16 %v874_v54, %v872_v53  ;;  %v2185_v59 = vpack.c.bf16 %v879_v56, %v877_v55  ;;  %v2215_v53 = vpack.c.bf16 %v1218_v50, %v1216_v49  ;;  %v1220_v55 = vld [vmem:[#allocation5 + $0x220] sm:$0xff]  ;;  %v1222_v56 = vld [vmem:[#allocation5 + $0x230] sm:$0xff]  ;;  %v1257_v50 = vld [vmem:[#allocation5 + $0x348] sm:$0xff] }
 0x13b   : > { %v1254_v49 = vld [vmem:[#allocation5 + $0x330] sm:$0xff] }
 0x13d   : > { %2152 = vmatpush1.bf16.msra.mxu0 %v2151_v4  ;;  %v2189_v4 = vpack.c.bf16 %v883_v0, %v881_v62  ;;  %v1226_v62 = vld [vmem:[#allocation5 + $0x250] sm:$0xff]  ;;  %v1231_v0 = vld [vmem:[#allocation5 + $0x278] sm:$0xff] }
 0x13e   : > { %2154 = vmatprep.subr.bf16.mxu0 %v2153_v5  ;;  %v880_v5 = vld [vmem:[#allocation2 + $0x580] sm:$0xff] }
 0x13f   : > { %v2191_v12 = vpack.c.bf16 %v882_v6, %v880_v5  ;;  %v1228_v5 = vld [vmem:[#allocation5 + $0x260] sm:$0xff]  ;;  %v1233_v6 = vld [vmem:[#allocation5 + $0x288] sm:$0xff] }
 0x141   : > { %2156 = vmatpush1.bf16.msra.mxu0 %v2155_v13  ;;  %v2193_v13 = vpack.c.bf16 %v887_v10, %v885_v7  ;;  %v1235_v7 = vld [vmem:[#allocation5 + $0x298] sm:$0xff] }
 0x142   : > { %2158 = vmatprep.subr.bf16.mxu0 %v2157_v14  ;;  %v884_v14 = vld [vmem:[#allocation2 + $0x5a0] sm:$0xff] }
 0x143   : > { %v2195_v18 = vpack.c.bf16 %v886_v15, %v884_v14  ;;  %v1234_v14 = vld [vmem:[#allocation5 + $0x290] sm:$0xff]  ;;  %v1237_v15 = vld [vmem:[#allocation5 + $0x2a8] sm:$0xff] }
 0x145   : > { %2160 = vmatpush1.bf16.msra.mxu0 %v2159_v19  ;;  %v2197_v19 = vpack.c.bf16 %v891_v17, %v889_v16  ;;  %v1239_v16 = vld [vmem:[#allocation5 + $0x2b8] sm:$0xff] }
 0x146   : > { %2162 = vmatprep.subr.bf16.mxu0 %v2161_v20  ;;  %v888_v20 = vld [vmem:[#allocation2 + $0x5c0] sm:$0xff] }
 0x147   : > { %v2199_v9 = vpack.c.bf16 %v890_v23, %v888_v20  ;;  %v1241_v20 = vld [vmem:[#allocation5 + $0x2c8] sm:$0xff]  ;;  %v1243_v23 = vld [vmem:[#allocation5 + $0x2d8] sm:$0xff] }
 0x149   : > { %2164 = vmatpush1.bf16.msra.mxu0 %v2163_v26  ;;  %v2201_v26 = vpack.c.bf16 %v895_v25, %v893_v24  ;;  %v2237_v25 = vpack.c.bf16 %v1243_v23, %v1241_v20  ;;  %v1279_v20 = vld [vmem:[#allocation5 + $0x3f8] sm:$0xff] }
 0x14a   : > { %2166 = vmatprep.subr.bf16.mxu0 %v2165_v8  ;;  %v892_v8 = vld [vmem:[#allocation2 + $0x5e0] sm:$0xff] }
 0x14b   : > { %v2203_v28 = vpack.c.bf16 %v894_v27, %v892_v8  ;;  %v1245_v8 = vld [vmem:[#allocation5 + $0x2e8] sm:$0xff]  ;;  %v1247_v27 = vld [vmem:[#allocation5 + $0x2f8] sm:$0xff] }
 0x14d   : > { %2168 = vmatpush1.bf16.msra.mxu0 %v2167_v33  ;;  %v2907_v33 = vsub.s32 0, %v2841_v2 }
 0x14e   : > { %2170 = vmatprep.subr.bf16.mxu0 %v2169_v11 }
 0x14f   : > { %v982_v35 = vrot.slane %v977_v32, %v2907_v33  ;;  %v2241_v32 = vpack.c.bf16 %v1247_v27, %v1245_v8  ;;  %v1154_v8 = vld [vmem:[#allocation5 + $0x18] sm:$0xff] }
 0x151   : > { %2172 = vmatpush1.bf16.msra.mxu0 %v2171_v38 }
 0x152   : > { %2174 = vmatprep.subr.bf16.mxu0 %v2173_v39 }
 0x155   : > { %2176 = vmatpush1.bf16.msra.mxu0 %v2175_v44 }
 0x156   : > { %2178 = vmatprep.subr.bf16.mxu0 %v2177_v45  ;;  %v1217_v45 = vld [vmem:[#allocation5 + $0x208] sm:$0xff] }
 0x157   : > { %v2213_v47 = vpack.c.bf16 %v1219_v46, %v1217_v45 }
 0x159   : > { %2180 = vmatpush1.bf16.msra.mxu0 %v2179_v51  ;;  %v1221_v51 = vld [vmem:[#allocation5 + $0x228] sm:$0xff] }
 0x15a   : > { %2182 = vmatprep.subr.bf16.mxu0 %v2181_v52  ;;  %v1223_v52 = vld [vmem:[#allocation5 + $0x238] sm:$0xff] }
 0x15b   : > { %v2217_v54 = vpack.c.bf16 %v1223_v52, %v1221_v51  ;;  %v1259_v51 = vld [vmem:[#allocation5 + $0x358] sm:$0xff] }
 0x15d   : > { %2184 = vmatpush1.bf16.msra.mxu0 %v2183_v57  ;;  %v1225_v57 = vld [vmem:[#allocation5 + $0x248] sm:$0xff] }
 0x15e   : > { %2186 = vmatprep.subr.bf16.mxu0 %v2185_v59  ;;  %v1227_v59 = vld [vmem:[#allocation5 + $0x258] sm:$0xff] }
 0x15f   : > { %v2221_v60 = vpack.c.bf16 %v1227_v59, %v1225_v57  ;;  %v1263_v57 = vld [vmem:[#allocation5 + $0x378] sm:$0xff] }
 0x161   : > { %2188 = vmatpush1.bf16.msra.mxu0 %v2187_v3  ;;  %v2223_v3 = vpack.c.bf16 %v1226_v62, %v1224_v61  ;;  %v1262_v61 = vld [vmem:[#allocation5 + $0x370] sm:$0xff]  ;;  %v1265_v62 = vld [vmem:[#allocation5 + $0x388] sm:$0xff] }
 0x162   : > { %2190 = vmatprep.subr.bf16.mxu0 %v2189_v4 }
 0x165   : > { %2192 = vmatpush1.bf16.msra.mxu0 %v2191_v12  ;;  %v2229_v12 = vpack.c.bf16 %v1235_v7, %v1233_v6  ;;  %v1271_v6 = vld [vmem:[#allocation5 + $0x3b8] sm:$0xff] }
 0x166   : > { %2194 = vmatprep.subr.bf16.mxu0 %v2193_v13  ;;  %v1232_v13 = vld [vmem:[#allocation5 + $0x280] sm:$0xff] }
 0x167   : > { %v2231_v17 = vpack.c.bf16 %v1234_v14, %v1232_v13  ;;  %v1270_v13 = vld [vmem:[#allocation5 + $0x3b0] sm:$0xff]  ;;  %v1273_v14 = vld [vmem:[#allocation5 + $0x3c8] sm:$0xff] }
 0x169   : > { %2196 = vmatpush1.bf16.msra.mxu0 %v2195_v18  ;;  %v1236_v18 = vld [vmem:[#allocation5 + $0x2a0] sm:$0xff] }
 0x16a   : > { %2198 = vmatprep.subr.bf16.mxu0 %v2197_v19  ;;  %v1238_v19 = vld [vmem:[#allocation5 + $0x2b0] sm:$0xff] }
 0x16b   : > { %v2235_v24 = vpack.c.bf16 %v1238_v19, %v1236_v18  ;;  %v1274_v18 = vld [vmem:[#allocation5 + $0x3d0] sm:$0xff]  ;;  %v1277_v19 = vld [vmem:[#allocation5 + $0x3e8] sm:$0xff] }
 0x16d   : > { %2200 = vmatpush1.bf16.msra.mxu0 %v2199_v9  ;;  %v1240_v9 = vld [vmem:[#allocation5 + $0x2c0] sm:$0xff] }
 0x16e   : > { %2202 = vmatprep.subr.bf16.mxu0 %v2201_v26  ;;  %v1242_v26 = vld [vmem:[#allocation5 + $0x2d0] sm:$0xff] }
 0x171   : > { %2204 = vmatpush1.bf16.msra.mxu0 %v2203_v28  ;;  %v2239_v28 = vpack.c.bf16 %v1242_v26, %v1240_v9  ;;  %v1278_v9 = vld [vmem:[#allocation5 + $0x3f0] sm:$0xff]  ;;  %v1152_v26 = vld [vmem:[#allocation5 + $0x8] sm:$0xff] }
 0x174   : > { %961 = vmatmul.mubr.f32.vlgmr.msra.gmra.mrb[4].mxu0 %v2891_v48 }
 0x175   : > { %966 = vmatprep.mubr.f32.mxu0 %v2895_v63 }
 0x178   : > { %967 = vmatmul.mubr.f32.gmra.mrb[6].mxu0 %v2893_v58 }
 0x247   : > { %v962_v11 = vpop.f32.mrb[4].mxu0 }
 0x248   : > { %v964_v48 = vpop.f32.mrb[5].mxu0  ;;  %v2911_v37 = vadd.f32 %v982_v35, %v962_v11  ;;  %v1244_v11 = vld [vmem:[#allocation5 + $0x2e0] sm:$0xff] }
 0x249   : > { %v990_v36 = vadd.f32 %v986_v34, %v964_v48  ;;  %v1251_v48 = vld [vmem:[#allocation5 + $0x318] sm:$0xff] }
 0x24a   : > { %v993_v42 = vmax.f32 %v2911_v37, 0.0  ;;  %v1163_v37 = vld [vmem:[#allocation5 + $0x60] sm:$0xff] }
 0x24b   : > { %v968_v63 = vpop.f32.mrb[6].mxu0  ;;  %v994_v41 = vmax.f32 %v990_v36, 0.0 }
 0x24c   : > { %v2913_v58 = vadd.f32 %v982_v35, %v968_v63  ;;  %v970_v38 = vpop.f32.mrb[7].mxu0  ;;  %v1249_v35 = vld [vmem:[#allocation5 + $0x308] sm:$0xff] }
 0x24d   : > { %v2915_v39 = vadd.f32 %v986_v34, %v970_v38  ;;  %v1246_v34 = vld [vmem:[#allocation5 + $0x2f0] sm:$0xff]  ;;  %v2245_v63 = vpack.c.bf16 %v1251_v48, %v1249_v35  ;;  %v1248_v38 = vld [vmem:[#allocation5 + $0x300] sm:$0xff]  ;;  %v1158_v35 = vld [vmem:[#allocation5 + $0x38] sm:$0xff] }
 0x24e   : > { %v995_v40 = vmax.f32 %v2913_v58, 0.0  ;;  %v2243_v36 = vpack.c.bf16 %v1246_v34, %v1244_v11  ;;  %v1153_v11 = vld [vmem:[#allocation5 + $0x10] sm:$0xff]  ;;  %v1156_v34 = vld [vmem:[#allocation5 + $0x28] sm:$0xff] }
 0x24f   : > { %v996_v2 = vmax.f32 %v2915_v39, 0.0  ;;  %v1170_v39 = vld [vmem:[#allocation5 + $0x98] sm:$0xff] }
 0x250   : > { %v2207_v44 = vpack.c.bf16 %v995_v40, %v993_v42 }
 0x251   : > { %v2205_v43 = vpack.c.bf16 %v996_v2, %v994_v41 }
 0x253   : > { %2206 = vmatprep.subr.bf16.mxu1 %v2205_v43 }
 0x254   : > { %2208 = vmatpush1.bf16.msra.mxu1 %v2207_v44 }
 0x255   : > { %2210 = vmatprep.subr.bf16.mxu1 %v2205_v43  ;;  %v1253_v43 = vld [vmem:[#allocation5 + $0x328] sm:$0xff] }
 0x257   : > { %1954 = vmatmul.mubr.msk.f32.vlgmr.msra.gmra.mrb[4].mxu1 %vm381_vm2, %v2865_v21  ;;  %v2219_v21 = vpack.c.bf16 %v1222_v56, %v1220_v55  ;;  %v1258_v55 = vld [vmem:[#allocation5 + $0x350] sm:$0xff]  ;;  %v1261_v56 = vld [vmem:[#allocation5 + $0x368] sm:$0xff] }
 0x258   : > { %2212 = vmatpush1.bf16.msra.mxu1 %v2207_v44  ;;  %1067 = vmatprep.mubr.f32.mxu1 %v2663_v1  ;;  %v1255_v44 = vld [vmem:[#allocation5 + $0x338] sm:$0xff] }
 0x259   : > { %2214 = vmatprep.subr.bf16.mxu1 %v2213_v47  ;;  %v2249_v46 = vpack.c.bf16 %v1255_v44, %v1253_v43  ;;  %v1252_v47 = vld [vmem:[#allocation5 + $0x320] sm:$0xff]  ;;  %v1162_v43 = vld [vmem:[#allocation5 + $0x58] sm:$0xff] }
 0x25a   : > { %v2251_v52 = vpack.c.bf16 %v1254_v49, %v1252_v47  ;;  %v1161_v47 = vld [vmem:[#allocation5 + $0x50] sm:$0xff]  ;;  %v1164_v49 = vld [vmem:[#allocation5 + $0x68] sm:$0xff] }
 0x25b   : > { %1955 = vmatmul.mubr.msk.f32.gmra.mrb[6].mxu1 %vm381_vm2, %v2877_v29  ;;  %v1229_v29 = vld [vmem:[#allocation5 + $0x268] sm:$0xff] }
 0x25c   : > { %1138 = vmatprep.mubr.f32.mxu1 %v2663_v1  ;;  %v2225_v4 = vpack.c.bf16 %v1231_v0, %v1229_v29  ;;  %v1267_v29 = vld [vmem:[#allocation5 + $0x398] sm:$0xff] }
 0x25f   : > { %1956 = vmatmul.mubr.msk.f32.vlgmr.msra.gmra.mrb[8].mxu1 %vm381_vm2, %v2869_v22  ;;  %v1230_v22 = vld [vmem:[#allocation5 + $0x270] sm:$0xff] }
 0x260   : > { %2216 = vmatpush1.bf16.msra.mxu1 %v2215_v53  ;;  %1144 = vmatprep.mubr.f32.mxu1 %v2663_v1  ;;  %v2227_v10 = vpack.c.bf16 %v1230_v22, %v1228_v5  ;;  %v2253_v53 = vpack.c.bf16 %v1259_v51, %v1257_v50  ;;  %v1266_v5 = vld [vmem:[#allocation5 + $0x390] sm:$0xff]  ;;  %v1269_v22 = vld [vmem:[#allocation5 + $0x3a8] sm:$0xff]  ;;  %v1166_v50 = vld [vmem:[#allocation5 + $0x78] sm:$0xff] }
 0x261   : > { %2218 = vmatprep.subr.bf16.mxu1 %v2217_v54  ;;  %v1256_v54 = vld [vmem:[#allocation5 + $0x340] sm:$0xff] }
 0x262   : > { %v2255_v59 = vpack.c.bf16 %v1258_v55, %v1256_v54  ;;  %v1167_v55 = vld [vmem:[#allocation5 + $0x80] sm:$0xff] }
 0x263   : > { %1957 = vmatmul.mubr.msk.f32.gmra.mrb[10].mxu1 %vm381_vm2, %v2881_v30  ;;  %v2233_v30 = vpack.c.bf16 %v1239_v16, %v1237_v15  ;;  %v1275_v15 = vld [vmem:[#allocation5 + $0x3d8] sm:$0xff] }
 0x264   : > { %2220 = vmatpush1.bf16.msra.mxu1 %v2219_v21  ;;  %1344 = vmatprep.mubr.f32.mxu1 %v994_v41  ;;  %v1250_v41 = vld [vmem:[#allocation5 + $0x310] sm:$0xff]  ;;  %v2257_v21 = vpack.c.bf16 %v1263_v57, %v1261_v56  ;;  %v1172_v57 = vld [vmem:[#allocation5 + $0xa8] sm:$0xff] }
 0x265   : > { %2222 = vmatprep.subr.bf16.mxu1 %v2221_v60  ;;  %v2247_v45 = vpack.c.bf16 %v1250_v41, %v1248_v38  ;;  %v1260_v60 = vld [vmem:[#allocation5 + $0x360] sm:$0xff]  ;;  %v1157_v38 = vld [vmem:[#allocation5 + $0x30] sm:$0xff]  ;;  %v1160_v41 = vld [vmem:[#allocation5 + $0x48] sm:$0xff] }
 0x266   : > { %v2259_v0 = vpack.c.bf16 %v1262_v61, %v1260_v60  ;;  %v1169_v56 = vld [vmem:[#allocation5 + $0x90] sm:$0xff]  ;;  %v1176_v61 = vld [vmem:[#allocation5 + $0xc8] sm:$0xff] }
 0x267   : > { %v1173_v60 = vld [vmem:[#allocation5 + $0xb0] sm:$0xff] }
 0x268   : > { %2224 = vmatpush1.bf16.msra.mxu1 %v2223_v3  ;;  %v2261_v3 = vpack.c.bf16 %v1267_v29, %v1265_v62  ;;  %v1178_v62 = vld [vmem:[#allocation5 + $0xd8] sm:$0xff] }
 0x269   : > { %2226 = vmatprep.subr.bf16.mxu1 %v2225_v4  ;;  %v1264_v4 = vld [vmem:[#allocation5 + $0x380] sm:$0xff] }
 0x26a   : > { %v2263_v7 = vpack.c.bf16 %v1266_v5, %v1264_v4  ;;  %v1177_v4 = vld [vmem:[#allocation5 + $0xd0] sm:$0xff]  ;;  %v1180_v5 = vld [vmem:[#allocation5 + $0xe8] sm:$0xff] }
 0x26c   : > { %2228 = vmatpush1.bf16.msra.mxu1 %v2227_v10  ;;  %v2265_v10 = vpack.c.bf16 %v1271_v6, %v1269_v22  ;;  %v1182_v22 = vld [vmem:[#allocation5 + $0xf8] sm:$0xff] }
 0x26d   : > { %2230 = vmatprep.subr.bf16.mxu1 %v2229_v12  ;;  %v1268_v12 = vld [vmem:[#allocation5 + $0x3a0] sm:$0xff] }
 0x26e   : > { %v2267_v16 = vpack.c.bf16 %v1270_v13, %v1268_v12  ;;  %v1181_v12 = vld [vmem:[#allocation5 + $0xf0] sm:$0xff]  ;;  %v1184_v13 = vld [vmem:[#allocation5 + $0x108] sm:$0xff] }
 0x270   : > { %2232 = vmatpush1.bf16.msra.mxu1 %v2231_v17  ;;  %v2269_v17 = vpack.c.bf16 %v1275_v15, %v1273_v14  ;;  %v1186_v14 = vld [vmem:[#allocation5 + $0x118] sm:$0xff] }
 0x271   : > { %2234 = vmatprep.subr.bf16.mxu1 %v2233_v30  ;;  %v1272_v30 = vld [vmem:[#allocation5 + $0x3c0] sm:$0xff] }
 0x272   : > { %v2271_v23 = vpack.c.bf16 %v1274_v18, %v1272_v30  ;;  %v1185_v30 = vld [vmem:[#allocation5 + $0x110] sm:$0xff]  ;;  %v1188_v18 = vld [vmem:[#allocation5 + $0x128] sm:$0xff] }
 0x274   : > { %2236 = vmatpush1.bf16.msra.mxu1 %v2235_v24  ;;  %v2273_v24 = vpack.c.bf16 %v1279_v20, %v1277_v19  ;;  %v1190_v19 = vld [vmem:[#allocation5 + $0x138] sm:$0xff] }
 0x275   : > { %2238 = vmatprep.subr.bf16.mxu1 %v2237_v25  ;;  %v1276_v25 = vld [vmem:[#allocation5 + $0x3e0] sm:$0xff] }
 0x276   : > { %v2275_v27 = vpack.c.bf16 %v1278_v9, %v1276_v25  ;;  %v1189_v25 = vld [vmem:[#allocation5 + $0x130] sm:$0xff]  ;;  %v1192_v9 = vld [vmem:[#allocation5 + $0x148] sm:$0xff] }
 0x278   : > { %2240 = vmatpush1.bf16.msra.mxu1 %v2239_v28  ;;  %v2277_v28 = vpack.c.bf16 %v1154_v8, %v1152_v26  ;;  %v1194_v26 = vld [vmem:[#allocation5 + $0x158] sm:$0xff] }
 0x279   : > { %2242 = vmatprep.subr.bf16.mxu1 %v2241_v32  ;;  %v1151_v32 = vld [vmem:[#allocation5] sm:$0xff] }
 0x27a   : > { %v2279_v48 = vpack.c.bf16 %v1153_v11, %v1151_v32  ;;  %v1193_v32 = vld [vmem:[#allocation5 + $0x150] sm:$0xff]  ;;  %v1196_v11 = vld [vmem:[#allocation5 + $0x168] sm:$0xff] }
 0x27c   : > { %2244 = vmatpush1.bf16.msra.mxu1 %v2243_v36  ;;  %v2281_v36 = vpack.c.bf16 %v1158_v35, %v1156_v34  ;;  %v1198_v34 = vld [vmem:[#allocation5 + $0x178] sm:$0xff] }
 0x27d   : > { %2246 = vmatprep.subr.bf16.mxu1 %v2245_v63  ;;  %v1155_v63 = vld [vmem:[#allocation5 + $0x20] sm:$0xff] }
 0x27e   : > { %v2283_v44 = vpack.c.bf16 %v1157_v38, %v1155_v63  ;;  %v1197_v63 = vld [vmem:[#allocation5 + $0x170] sm:$0xff]  ;;  %v1200_v38 = vld [vmem:[#allocation5 + $0x188] sm:$0xff] }
 0x280   : > { %2248 = vmatpush1.bf16.msra.mxu1 %v2247_v45  ;;  %v2285_v45 = vpack.c.bf16 %v1162_v43, %v1160_v41  ;;  %v1202_v41 = vld [vmem:[#allocation5 + $0x198] sm:$0xff] }
 0x281   : > { %2250 = vmatprep.subr.bf16.mxu1 %v2249_v46  ;;  %v1159_v46 = vld [vmem:[#allocation5 + $0x40] sm:$0xff] }
 0x282   : > { %v2287_v51 = vpack.c.bf16 %v1161_v47, %v1159_v46  ;;  %v1201_v46 = vld [vmem:[#allocation5 + $0x190] sm:$0xff]  ;;  %v1204_v47 = vld [vmem:[#allocation5 + $0x1a8] sm:$0xff] }
 0x284   : > { %2252 = vmatpush1.bf16.msra.mxu1 %v2251_v52  ;;  %v2289_v52 = vpack.c.bf16 %v1166_v50, %v1164_v49  ;;  %v1206_v49 = vld [vmem:[#allocation5 + $0x1b8] sm:$0xff] }
 0x285   : > { %2254 = vmatprep.subr.bf16.mxu1 %v2253_v53  ;;  %v1168_v53 = vld [vmem:[#allocation5 + $0x88] sm:$0xff] }
 0x286   : > { %v2293_v54 = vpack.c.bf16 %v1170_v39, %v1168_v53  ;;  %v1210_v53 = vld [vmem:[#allocation5 + $0x1d8] sm:$0xff] }
 0x288   : > { %2256 = vmatpush1.bf16.msra.mxu1 %v2255_v59  ;;  %v1174_v59 = vld [vmem:[#allocation5 + $0xb8] sm:$0xff] }
 0x289   : > { %2258 = vmatprep.subr.bf16.mxu1 %v2257_v21  ;;  %v2295_v21 = vpack.c.bf16 %v1169_v56, %v1167_v55  ;;  %v2297_v58 = vpack.c.bf16 %v1174_v59, %v1172_v57  ;;  %v1209_v55 = vld [vmem:[#allocation5 + $0x1d0] sm:$0xff]  ;;  %v1212_v56 = vld [vmem:[#allocation5 + $0x1e8] sm:$0xff]  ;;  %v1214_v57 = vld [vmem:[#allocation5 + $0x1f8] sm:$0xff] }
 0x28c   : > { %2260 = vmatpush1.bf16.msra.mxu1 %v2259_v0  ;;  %v2301_v0 = vpack.c.bf16 %v1178_v62, %v1176_v61  ;;  %v1438_v61 = vld [vmem:[#allocation5 + $0x418] sm:$0xff] }
 0x28d   : > { %2262 = vmatprep.subr.bf16.mxu1 %v2261_v3  ;;  %v1175_v3 = vld [vmem:[#allocation5 + $0xc0] sm:$0xff] }
 0x28e   : > { %v2303_v6 = vpack.c.bf16 %v1177_v4, %v1175_v3  ;;  %v1627_v3 = vld [vmem:[%s3126_s5 + $0x88] sm:$0xff]  ;;  %v1610_v4 = vld [vmem:[%s3126_s5] sm:$0xff] }
 0x290   : > { %2264 = vmatpush1.bf16.msra.mxu1 %v2263_v7  ;;  %v2305_v7 = vpack.c.bf16 %v1182_v22, %v1180_v5  ;;  %v1611_v22 = vld [vmem:[%s3126_s5 + $0x8] sm:$0xff] }
 0x291   : > { %2266 = vmatprep.subr.bf16.mxu1 %v2265_v10  ;;  %v1179_v10 = vld [vmem:[#allocation5 + $0xe0] sm:$0xff] }
 0x292   : > { %v2307_v15 = vpack.c.bf16 %v1181_v12, %v1179_v10  ;;  %v2407_v10 = vpack.c.bf16 %v1611_v22, %v1610_v4  ;;  %v1463_v22 = vld [vmem:[#allocation5 + $0x4e0] sm:$0xff] }
 0x294   : > { %2268 = vmatpush1.bf16.msra.mxu1 %v2267_v16  ;;  %v2309_v16 = vpack.c.bf16 %v1186_v14, %v1184_v13  ;;  %v1612_v13 = vld [vmem:[%s3126_s5 + $0x10] sm:$0xff]  ;;  %v1613_v14 = vld [vmem:[%s3126_s5 + $0x18] sm:$0xff] }
 0x295   : > { %2270 = vmatprep.subr.bf16.mxu1 %v2269_v17  ;;  %v1183_v17 = vld [vmem:[#allocation5 + $0x100] sm:$0xff] }
 0x296   : > { %v2311_v20 = vpack.c.bf16 %v1185_v30, %v1183_v17  ;;  %v2411_v17 = vpack.c.bf16 %v1613_v14, %v1612_v13  ;;  %v1467_v14 = vld [vmem:[#allocation5 + $0x500] sm:$0xff] }
 0x298   : > { %2272 = vmatpush1.bf16.msra.mxu1 %v2271_v23  ;;  %v2313_v23 = vpack.c.bf16 %v1190_v19, %v1188_v18  ;;  %v1435_v18 = vld [vmem:[#allocation5 + $0x400] sm:$0xff]  ;;  %v1437_v19 = vld [vmem:[#allocation5 + $0x410] sm:$0xff] }
 0x299   : > { %2274 = vmatprep.subr.bf16.mxu1 %v2273_v24  ;;  %v1187_v24 = vld [vmem:[#allocation5 + $0x120] sm:$0xff] }
 0x29a   : > { %v2315_v8 = vpack.c.bf16 %v1189_v25, %v1187_v24  ;;  %v2343_v25 = vpack.c.bf16 %v1437_v19, %v1435_v18  ;;  %v1471_v19 = vld [vmem:[#allocation5 + $0x520] sm:$0xff] }
 0x29c   : > { %2276 = vmatpush1.bf16.msra.mxu1 %v2275_v27  ;;  %v2317_v27 = vpack.c.bf16 %v1194_v26, %v1192_v9 }
 0x29d   : > { %2278 = vmatprep.subr.bf16.mxu1 %v2277_v28  ;;  %v1191_v28 = vld [vmem:[#allocation5 + $0x140] sm:$0xff] }
 0x29e   : > { %v2319_v35 = vpack.c.bf16 %v1193_v32, %v1191_v28  ;;  %v1444_v28 = vld [vmem:[#allocation5 + $0x448] sm:$0xff]  ;;  %v1446_v32 = vld [vmem:[#allocation5 + $0x458] sm:$0xff] }
 0x29f   : > { %1345 = vmatmul.mubr.f32.vlgmr.msra.gmra.mrb[12].mxu1 %v993_v42  ;;  %v1165_v42 = vld [vmem:[#allocation5 + $0x70] sm:$0xff] }
 0x2a0   : > { %1350 = vmatprep.mubr.f32.mxu1 %v996_v2  ;;  %2280 = vmatpush1.bf16.msra.mxu1 %v2279_v48  ;;  %v2291_v2 = vpack.c.bf16 %v1165_v42, %v1163_v37  ;;  %v2321_v48 = vpack.c.bf16 %v1198_v34, %v1196_v11  ;;  %v1205_v37 = vld [vmem:[#allocation5 + $0x1b0] sm:$0xff]  ;;  %v1208_v42 = vld [vmem:[#allocation5 + $0x1c8] sm:$0xff] }
 0x2a1   : > { %2282 = vmatprep.subr.bf16.mxu1 %v2281_v36  ;;  %v1195_v36 = vld [vmem:[#allocation5 + $0x160] sm:$0xff] }
 0x2a2   : > { %v2323_v43 = vpack.c.bf16 %v1197_v63, %v1195_v36  ;;  %v1445_v36 = vld [vmem:[#allocation5 + $0x450] sm:$0xff] }
 0x2a3   : > { %1351 = vmatmul.mubr.f32.gmra.mrb[14].mxu1 %v995_v40  ;;  %v1171_v40 = vld [vmem:[#allocation5 + $0xa0] sm:$0xff] }
 0x2a4   : > { %2284 = vmatpush1.bf16.msra.mxu1 %v2283_v44  ;;  %v2299_v29 = vpack.c.bf16 %v1173_v60, %v1171_v40  ;;  %v2325_v44 = vpack.c.bf16 %v1202_v41, %v1200_v38  ;;  %v1213_v40 = vld [vmem:[#allocation5 + $0x1f0] sm:$0xff]  ;;  %v1436_v60 = vld [vmem:[#allocation5 + $0x408] sm:$0xff]  ;;  %v1450_v41 = vld [vmem:[#allocation5 + $0x478] sm:$0xff] }
 0x2a5   : > { %2286 = vmatprep.subr.bf16.mxu1 %v2285_v45  ;;  %v1199_v45 = vld [vmem:[#allocation5 + $0x180] sm:$0xff]  ;;  %v1448_v38 = vld [vmem:[#allocation5 + $0x468] sm:$0xff] }
 0x2a6   : > { %v2327_v50 = vpack.c.bf16 %v1201_v46, %v1199_v45  ;;  %v2353_v45 = vpack.c.bf16 %v1450_v41, %v1448_v38  ;;  %v1447_v46 = vld [vmem:[#allocation5 + $0x460] sm:$0xff] }
 0x2a7   : > { %v1483_v41 = vld [vmem:[#allocation5 + $0x580] sm:$0xff] }
 0x2a8   : > { %2288 = vmatpush1.bf16.msra.mxu1 %v2287_v51  ;;  %v2329_v51 = vpack.c.bf16 %v1206_v49, %v1204_v47  ;;  %v1449_v47 = vld [vmem:[#allocation5 + $0x470] sm:$0xff] }
 0x2a9   : > { %2290 = vmatprep.subr.bf16.mxu1 %v2289_v52  ;;  %v1203_v52 = vld [vmem:[#allocation5 + $0x1a0] sm:$0xff] }
 0x2aa   : > { %v2331_v39 = vpack.c.bf16 %v1205_v37, %v1203_v52  ;;  %v2355_v52 = vpack.c.bf16 %v1449_v47, %v1447_v46  ;;  %v1490_v46 = vld [vmem:[#allocation5 + $0x5b8] sm:$0xff] }
 0x2ac   : > { %2292 = vmatpush1.bf16.msra.mxu1 %v2291_v2  ;;  %v2333_v2 = vpack.c.bf16 %v1210_v53, %v1208_v42  ;;  %v1451_v53 = vld [vmem:[#allocation5 + $0x480] sm:$0xff] }
 0x2ad   : > { %2294 = vmatprep.subr.bf16.mxu1 %v2293_v54  ;;  %v1207_v54 = vld [vmem:[#allocation5 + $0x1c0] sm:$0xff] }
 0x2ae   : > { %v2335_v59 = vpack.c.bf16 %v1209_v55, %v1207_v54  ;;  %v1456_v54 = vld [vmem:[#allocation5 + $0x4a8] sm:$0xff]  ;;  %v1458_v55 = vld [vmem:[#allocation5 + $0x4b8] sm:$0xff] }
 0x2b0   : > { %2296 = vmatpush1.bf16.msra.mxu1 %v2295_v21  ;;  %v2337_v21 = vpack.c.bf16 %v1214_v57, %v1212_v56  ;;  %v2361_v57 = vpack.c.bf16 %v1458_v55, %v1456_v54  ;;  %v1491_v54 = vld [vmem:[#allocation5 + $0x5c0] sm:$0xff]  ;;  %v1493_v55 = vld [vmem:[#allocation5 + $0x5d0] sm:$0xff] }
 0x2b1   : > { %2298 = vmatprep.subr.bf16.mxu1 %v2297_v58  ;;  %v1211_v58 = vld [vmem:[#allocation5 + $0x1e0] sm:$0xff] }
 0x2b2   : > { %v2339_v62 = vpack.c.bf16 %v1213_v40, %v1211_v58  ;;  %v1460_v58 = vld [vmem:[#allocation5 + $0x4c8] sm:$0xff]  ;;  %v1462_v40 = vld [vmem:[#allocation5 + $0x4d8] sm:$0xff] }
 0x2b4   : > { %2300 = vmatpush1.bf16.msra.mxu1 %v2299_v29  ;;  %v2341_v29 = vpack.c.bf16 %v1438_v61, %v1436_v60  ;;  %v2365_v61 = vpack.c.bf16 %v1462_v40, %v1460_v58  ;;  %v1495_v58 = vld [vmem:[#allocation5 + $0x5e0] sm:$0xff]  ;;  %v1497_v40 = vld [vmem:[#allocation5 + $0x5f0] sm:$0xff] }
 0x2b5   : > { %2302 = vmatprep.subr.bf16.mxu1 %v2301_v0  ;;  %v1626_v0 = vld [vmem:[%s3126_s5 + $0x80] sm:$0xff] }
 0x2b6   : > { %v2405_v5 = vpack.c.bf16 %v1627_v3, %v1626_v0  ;;  %v1464_v0 = vld [vmem:[#allocation5 + $0x4e8] sm:$0xff]  ;;  %v1466_v3 = vld [vmem:[#allocation5 + $0x4f8] sm:$0xff] }
 0x2b8   : > { %2304 = vmatpush1.bf16.msra.mxu1 %v2303_v6  ;;  %v1628_v6 = vld [vmem:[%s3126_s5 + $0x90] sm:$0xff]  ;;  %2406 = vmatprep.subr.bf16.mxu0 %v2405_v5  ;;  %v2369_v5 = vpack.c.bf16 %v1466_v3, %v1464_v0  ;;  %v1617_v0 = vld [vmem:[%s3126_s5 + $0x38] sm:$0xff] }
 0x2b9   : > { %2306 = vmatprep.subr.bf16.mxu1 %v2305_v7  ;;  %v1629_v7 = vld [vmem:[%s3126_s5 + $0x98] sm:$0xff]  ;;  %2408 = vmatpush3.bf16.msra.mxu0 %v2407_v10 }
 0x2ba   : > { %v2409_v12 = vpack.c.bf16 %v1629_v7, %v1628_v6  ;;  %v1465_v6 = vld [vmem:[#allocation5 + $0x4f0] sm:$0xff]  ;;  %v1468_v7 = vld [vmem:[#allocation5 + $0x508] sm:$0xff]  ;;  %v1470_v10 = vld [vmem:[#allocation5 + $0x518] sm:$0xff] }
 0x2bb   : > { %v2373_v13 = vpack.c.bf16 %v1470_v10, %v1468_v7  ;;  %v1619_v7 = vld [vmem:[%s3126_s5 + $0x48] sm:$0xff] }
 0x2bc   : > { %2308 = vmatpush1.bf16.msra.mxu1 %v2307_v15  ;;  %v1630_v15 = vld [vmem:[%s3126_s5 + $0xa0] sm:$0xff]  ;;  %2410 = vmatprep.subr.bf16.mxu0 %v2409_v12  ;;  %v2371_v12 = vpack.c.bf16 %v1465_v6, %v1463_v22 }
 0x2bd   : > { %2310 = vmatprep.subr.bf16.mxu1 %v2309_v16  ;;  %v1631_v16 = vld [vmem:[%s3126_s5 + $0xa8] sm:$0xff]  ;;  %2412 = vmatpush3.bf16.msra.mxu0 %v2411_v17  ;;  %v1474_v17 = vld [vmem:[#allocation5 + $0x538] sm:$0xff]  ;;  %v1618_v6 = vld [vmem:[%s3126_s5 + $0x40] sm:$0xff] }
 0x2be   : > { %v2413_v30 = vpack.c.bf16 %v1631_v16, %v1630_v15  ;;  %v1469_v15 = vld [vmem:[#allocation5 + $0x510] sm:$0xff]  ;;  %v1472_v16 = vld [vmem:[#allocation5 + $0x528] sm:$0xff]  ;;  %v2423_v10 = vpack.c.bf16 %v1619_v7, %v1618_v6 }
 0x2bf   : > { %v2377_v18 = vpack.c.bf16 %v1474_v17, %v1472_v16  ;;  %v1621_v16 = vld [vmem:[%s3126_s5 + $0x58] sm:$0xff] }
 0x2c0   : > { %2312 = vmatpush1.bf16.msra.mxu1 %v2311_v20  ;;  %2414 = vmatprep.subr.bf16.mxu0 %v2413_v30  ;;  %v1440_v20 = vld [vmem:[#allocation5 + $0x428] sm:$0xff]  ;;  %v2375_v30 = vpack.c.bf16 %v1469_v15, %v1467_v14  ;;  %v1620_v15 = vld [vmem:[%s3126_s5 + $0x50] sm:$0xff] }
 0x2c1   : > { %2314 = vmatprep.subr.bf16.mxu1 %v2313_v23  ;;  %v1442_v23 = vld [vmem:[#allocation5 + $0x438] sm:$0xff]  ;;  %v2427_v17 = vpack.c.bf16 %v1621_v16, %v1620_v15 }
 0x2c2   : > { %v2345_v26 = vpack.c.bf16 %v1442_v23, %v1440_v20  ;;  %v1473_v20 = vld [vmem:[#allocation5 + $0x530] sm:$0xff]  ;;  %v1476_v23 = vld [vmem:[#allocation5 + $0x548] sm:$0xff] }
 0x2c4   : > { %2316 = vmatpush1.bf16.msra.mxu1 %v2315_v8  ;;  %v1439_v8 = vld [vmem:[#allocation5 + $0x420] sm:$0xff] }
 0x2c5   : > { %2318 = vmatprep.subr.bf16.mxu1 %v2317_v27  ;;  %v1441_v27 = vld [vmem:[#allocation5 + $0x430] sm:$0xff] }
 0x2c6   : > { %v2347_v11 = vpack.c.bf16 %v1441_v27, %v1439_v8  ;;  %v1477_v8 = vld [vmem:[#allocation5 + $0x550] sm:$0xff]  ;;  %v1480_v27 = vld [vmem:[#allocation5 + $0x568] sm:$0xff] }
 0x2c8   : > { %2320 = vmatpush1.bf16.msra.mxu1 %v2319_v35  ;;  %v2349_v35 = vpack.c.bf16 %v1446_v32, %v1444_v28  ;;  %v1482_v28 = vld [vmem:[#allocation5 + $0x578] sm:$0xff] }
 0x2c9   : > { %2322 = vmatprep.subr.bf16.mxu1 %v2321_v48  ;;  %v1443_v48 = vld [vmem:[#allocation5 + $0x440] sm:$0xff] }
 0x2cc   : > { %2324 = vmatpush1.bf16.msra.mxu1 %v2323_v43  ;;  %v2351_v43 = vpack.c.bf16 %v1445_v36, %v1443_v48  ;;  %v1484_v48 = vld [vmem:[#allocation5 + $0x588] sm:$0xff]  ;;  %v1486_v36 = vld [vmem:[#allocation5 + $0x598] sm:$0xff] }
 0x2cd   : > { %2326 = vmatprep.subr.bf16.mxu1 %v2325_v44  ;;  %v2389_v38 = vpack.c.bf16 %v1486_v36, %v1484_v48 }
 0x2d0   : > { %2328 = vmatpush1.bf16.msra.mxu1 %v2327_v50  ;;  %v1452_v50 = vld [vmem:[#allocation5 + $0x488] sm:$0xff] }
 0x2d1   : > { %2330 = vmatprep.subr.bf16.mxu1 %v2329_v51  ;;  %v1454_v51 = vld [vmem:[#allocation5 + $0x498] sm:$0xff] }
 0x2d2   : > { %v2357_v42 = vpack.c.bf16 %v1454_v51, %v1452_v50  ;;  %v1487_v50 = vld [vmem:[#allocation5 + $0x5a0] sm:$0xff]  ;;  %v1489_v51 = vld [vmem:[#allocation5 + $0x5b0] sm:$0xff] }
 0x2d4   : > { %2332 = vmatpush1.bf16.msra.mxu1 %v2331_v39  ;;  %v1453_v39 = vld [vmem:[#allocation5 + $0x490] sm:$0xff] }
 0x2d5   : > { %2334 = vmatprep.subr.bf16.mxu1 %v2333_v2  ;;  %v2359_v56 = vpack.c.bf16 %v1453_v39, %v1451_v53  ;;  %v2395_v53 = vpack.c.bf16 %v1489_v51, %v1487_v50 }
 0x2d8   : > { %2336 = vmatpush1.bf16.msra.mxu1 %v2335_v59  ;;  %v1455_v59 = vld [vmem:[#allocation5 + $0x4a0] sm:$0xff] }
 0x2d9   : > { %2338 = vmatprep.subr.bf16.mxu1 %v2337_v21  ;;  %v1457_v21 = vld [vmem:[#allocation5 + $0x4b0] sm:$0xff] }
 0x2da   : > { %v2363_v60 = vpack.c.bf16 %v1457_v21, %v1455_v59  ;;  %v2399_v59 = vpack.c.bf16 %v1493_v55, %v1491_v54 }
 0x2dc   : > { %2340 = vmatpush1.bf16.msra.mxu1 %v2339_v62  ;;  %v1459_v62 = vld [vmem:[#allocation5 + $0x4c0] sm:$0xff] }
 0x2dd   : > { %2342 = vmatprep.subr.bf16.mxu1 %v2341_v29  ;;  %v1461_v29 = vld [vmem:[#allocation5 + $0x4d0] sm:$0xff] }
 0x2de   : > { %v2367_v4 = vpack.c.bf16 %v1461_v29, %v1459_v62  ;;  %v1615_v62 = vld [vmem:[%s3126_s5 + $0x28] sm:$0xff] }
 0x32a   : > { %v1063_v24 = vpop.f32.mrb[4].mxu1 }
 0x32b   : > { %v1065_v9 = vpop.f32.mrb[5].mxu1 }
 0x32c   : > { %1421 = vmatprep.mubr.f32.mxu1 %v1065_v9 }
 0x32d   : > { %1422 = vmatmul.mubr.f32.vlgmr.msra.gmra.mrb[12].mxu1 %v1063_v24  ;;  %v1478_v24 = vld [vmem:[#allocation5 + $0x558] sm:$0xff] }
 0x32e   : > { %2344 = vmatpush1.bf16.msra.mxu1 %v2343_v25  ;;  %v1069_v34 = vpop.f32.mrb[6].mxu1  ;;  %v2379_v25 = vpack.c.bf16 %v1473_v20, %v1471_v19  ;;  %v2381_v9 = vpack.c.bf16 %v1478_v24, %v1476_v23  ;;  %v1622_v20 = vld [vmem:[%s3126_s5 + $0x60] sm:$0xff]  ;;  %v1623_v23 = vld [vmem:[%s3126_s5 + $0x68] sm:$0xff] }
 0x32f   : > { %2346 = vmatprep.subr.bf16.mxu1 %v2345_v26  ;;  %v1071_v63 = vpop.f32.mrb[7].mxu1  ;;  %v1475_v26 = vld [vmem:[#allocation5 + $0x540] sm:$0xff]  ;;  %v2431_v24 = vpack.c.bf16 %v1623_v23, %v1622_v20 }
 0x330   : > { %1427 = vmatprep.mubr.f32.mxu1 %v1071_v63  ;;  %v2383_v32 = vpack.c.bf16 %v1477_v8, %v1475_v26  ;;  %v1624_v8 = vld [vmem:[%s3126_s5 + $0x70] sm:$0xff]  ;;  %v2527_v20 = vld [vmem:[%s2847_s27] sm:$0xff] }
 0x331   : > { %1428 = vmatmul.mubr.f32.gmra.mrb[14].mxu1 %v1069_v34  ;;  %v1479_v34 = vld [vmem:[#allocation5 + $0x560] sm:$0xff] }
 0x332   : > { %2348 = vmatpush1.bf16.msra.mxu1 %v2347_v11  ;;  %v2973_v44 = vpop.f32.mrb[8].mxu1  ;;  %v2385_v11 = vpack.c.bf16 %v1482_v28, %v1480_v27  ;;  %v1625_v27 = vld [vmem:[%s3126_s5 + $0x78] sm:$0xff] }
 0x333   : > { %2350 = vmatprep.subr.bf16.mxu1 %v2349_v35  ;;  %v1142_v49 = vpop.f32.mrb[9].mxu1  ;;  %v1481_v35 = vld [vmem:[#allocation5 + $0x570] sm:$0xff]  ;;  %v2435_v28 = vpack.c.bf16 %v1625_v27, %v1624_v8 }
 0x334   : > { %1563 = vmatprep.mubr.f32.mxu1 %v1142_v49  ;;  %v2387_v63 = vpack.c.bf16 %v1481_v35, %v1479_v34 }
 0x336   : > { %2352 = vmatpush1.bf16.msra.mxu1 %v2351_v43  ;;  %v2975_v37 = vpop.f32.mrb[10].mxu1  ;;  %v1485_v43 = vld [vmem:[#allocation5 + $0x590] sm:$0xff] }
 0x337   : > { %2354 = vmatprep.subr.bf16.mxu1 %v2353_v45  ;;  %v2977_v2 = vpop.f32.mrb[11].mxu1  ;;  %v1488_v45 = vld [vmem:[#allocation5 + $0x5a8] sm:$0xff]  ;;  %v2391_v47 = vpack.c.bf16 %v1485_v43, %v1483_v41 }
 0x338   : > { %v2393_v49 = vpack.c.bf16 %v1490_v46, %v1488_v45 }
 0x33a   : > { %2356 = vmatpush1.bf16.msra.mxu1 %v2355_v52  ;;  %v1492_v52 = vld [vmem:[#allocation5 + $0x5c8] sm:$0xff] }
 0x33b   : > { %2358 = vmatprep.subr.bf16.mxu1 %v2357_v42  ;;  %v1494_v42 = vld [vmem:[#allocation5 + $0x5d8] sm:$0xff] }
 0x33c   : > { %v2397_v39 = vpack.c.bf16 %v1494_v42, %v1492_v52 }
 0x33e   : > { %2360 = vmatpush1.bf16.msra.mxu1 %v2359_v56  ;;  %v1496_v56 = vld [vmem:[#allocation5 + $0x5e8] sm:$0xff] }
 0x33f   : > { %2362 = vmatprep.subr.bf16.mxu1 %v2361_v57  ;;  %v1498_v57 = vld [vmem:[#allocation5 + $0x5f8] sm:$0xff] }
 0x340   : > { %v2401_v21 = vpack.c.bf16 %v1498_v57, %v1496_v56 }
 0x342   : > { %2364 = vmatpush1.bf16.msra.mxu1 %v2363_v60  ;;  %v2403_v60 = vpack.c.bf16 %v1497_v40, %v1495_v58 }
 0x343   : > { %2366 = vmatprep.subr.bf16.mxu1 %v2365_v61  ;;  %v1614_v61 = vld [vmem:[%s3126_s5 + $0x20] sm:$0xff] }
 0x344   : > { %v2415_v29 = vpack.c.bf16 %v1615_v62, %v1614_v61 }
 0x346   : > { %2368 = vmatpush1.bf16.msra.mxu1 %v2367_v4  ;;  %2416 = vmatpush3.bf16.msra.mxu0 %v2415_v29  ;;  %v1634_v4 = vld [vmem:[%s3126_s5 + $0xc0] sm:$0xff] }
 0x347   : > { %2370 = vmatprep.subr.bf16.mxu1 %v2369_v5  ;;  %v1635_v5 = vld [vmem:[%s3126_s5 + $0xc8] sm:$0xff] }
 0x348   : > { %v2421_v22 = vpack.c.bf16 %v1635_v5, %v1634_v4 }
 0x34a   : > { %2372 = vmatpush1.bf16.msra.mxu1 %v2371_v12  ;;  %v1636_v12 = vld [vmem:[%s3126_s5 + $0xd0] sm:$0xff] }
 0x34b   : > { %2374 = vmatprep.subr.bf16.mxu1 %v2373_v13  ;;  %v1637_v13 = vld [vmem:[%s3126_s5 + $0xd8] sm:$0xff] }
 0x34c   : > { %v2425_v14 = vpack.c.bf16 %v1637_v13, %v1636_v12 }
 0x34e   : > { %2376 = vmatpush1.bf16.msra.mxu1 %v2375_v30  ;;  %v1638_v30 = vld [vmem:[%s3126_s5 + $0xe0] sm:$0xff] }
 0x34f   : > { %2378 = vmatprep.subr.bf16.mxu1 %v2377_v18  ;;  %v1639_v18 = vld [vmem:[%s3126_s5 + $0xe8] sm:$0xff] }
 0x350   : > { %v2429_v19 = vpack.c.bf16 %v1639_v18, %v1638_v30 }
 0x352   : > { %2380 = vmatpush1.bf16.msra.mxu1 %v2379_v25  ;;  %v1640_v25 = vld [vmem:[%s3126_s5 + $0xf0] sm:$0xff] }
 0x353   : > { %2382 = vmatprep.subr.bf16.mxu1 %v2381_v9  ;;  %v1641_v9 = vld [vmem:[%s3126_s5 + $0xf8] sm:$0xff] }
 0x354   : > { %v2433_v26 = vpack.c.bf16 %v1641_v9, %v1640_v25 }
 0x356   : > { %2384 = vmatpush1.bf16.msra.mxu1 %v2383_v32  ;;  %v1580_v32 = vld [vmem:[%s3125_s4] sm:$0x3] }
 0x357   : > { %2386 = vmatprep.subr.bf16.mxu1 %v2385_v11  ;;  %v1585_v34 = vrot.slane %v1580_v32, %v2907_v33  ;;  %v1589_v48 = vrot.slane %v1580_v32, %v2901_v31 }
 0x35a   : > { %2388 = vmatpush1.bf16.msra.mxu1 %v2387_v63 }
 0x35b   : > { %2390 = vmatprep.subr.bf16.mxu1 %v2389_v38 }
 0x35e   : > { %2392 = vmatpush1.bf16.msra.mxu1 %v2391_v47 }
 0x35f   : > { %2394 = vmatprep.subr.bf16.mxu1 %v2393_v49 }
 0x362   : > { %2396 = vmatpush1.bf16.msra.mxu1 %v2395_v53 }
 0x363   : > { %2398 = vmatprep.subr.bf16.mxu1 %v2397_v39 }
 0x366   : > { %2400 = vmatpush1.bf16.msra.mxu1 %v2399_v59 }
 0x367   : > { %2402 = vmatprep.subr.bf16.mxu1 %v2401_v21  ;;  %v1714_v21 = vld [vmem:[%s3128_s7] sm:$0xff] }
 0x368   : > { %v1717_v58 = vcombine.high %v1714_v21, %v1714_v21 }
 0x36a   : > { %2404 = vmatpush1.bf16.msra.mxu1 %v2403_v60  ;;  %v1642_v60 = vld [vmem:[%s3127_s6] sm:$0x1] }
 0x36b   : > { %1958 = vmatprep.subr.msk.mxu1 %vm1733_vm5, %v1717_v58 }
 0x36d   : > { %1564 = vmatmul.mubr.f32.vlgmr.msra.gmra.mrb[12].mxu1 %v2973_v44  ;;  %v1632_v44 = vld [vmem:[%s3126_s5 + $0xb0] sm:$0xff] }
 0x36e   : > { %1569 = vmatprep.mubr.f32.mxu1 %v2977_v2  ;;  %1959 = vmatpush1.msk.msra.mxu1 %vm1733_vm5, %v1714_v21 }
 0x371   : > { %1570 = vmatmul.mubr.f32.gmra.mrb[14].mxu1 %v2975_v37  ;;  %v1633_v37 = vld [vmem:[%s3126_s5 + $0xb8] sm:$0xff] }
 0x372   : > { %1802 = vmatprep.mubr.f32.mxu1 %v2663_v1  ;;  %v2417_v2 = vpack.c.bf16 %v1633_v37, %v1632_v44  ;;  %v1616_v1 = vld [vmem:[%s3126_s5 + $0x30] sm:$0xff]  ;;  %v1715_v37 = vld [vmem:[%s3129_s8] sm:$0x3] }
 0x373   : > { %v2419_v3 = vpack.c.bf16 %v1617_v0, %v1616_v1  ;;  %v1726_v1 = vrot.slane %v1715_v37, %v2901_v31 }
 0x374   : > { %2418 = vmatprep.subr.bf16.mxu0 %v2417_v2  ;;  %v1722_v2 = vrot.slane %v1715_v37, %v2907_v33 }
 0x375   : > { %2420 = vmatpush3.bf16.msra.mxu0 %v2419_v3 }
 0x376   : > { %2422 = vmatprep.subr.bf16.mxu0 %v2421_v22 }
 0x379   : > { %2424 = vmatpush3.bf16.msra.mxu0 %v2423_v10 }
 0x37a   : > { %2426 = vmatprep.subr.bf16.mxu0 %v2425_v14 }
 0x37d   : > { %2428 = vmatpush3.bf16.msra.mxu0 %v2427_v17 }
 0x37e   : > { %2430 = vmatprep.subr.bf16.mxu0 %v2429_v19 }
 0x381   : > { %2432 = vmatpush3.bf16.msra.mxu0 %v2431_v24  ;;  %v2528_v24 = vld [vmem:[%s2847_s27 + $0x10] sm:$0xff] }
 0x382   : > { %2434 = vmatprep.subr.bf16.mxu0 %v2433_v26  ;;  %v2530_v26 = vld [vmem:[%s2847_s27 + $0x18] sm:$0xff] }
 0x385   : > { %2436 = vmatpush3.bf16.msra.mxu0 %v2435_v28 }
 0x440   : > { %v1565_v11 = vpop.f32.mrb[12].mxu1 }
 0x441   : > { %v1567_v35 = vpop.f32.mrb[13].mxu1  ;;  %v1592_v63 = vadd.f32 %v1585_v34, %v1565_v11 }
 0x442   : > { %v1593_v43 = vadd.f32 %v1589_v48, %v1567_v35 }
 0x444   : > { %v1571_v36 = vpop.f32.mrb[14].mxu1 }
 0x445   : > { %v1594_v38 = vadd.f32 %v1585_v34, %v1571_v36  ;;  %v1573_v41 = vpop.f32.mrb[15].mxu1 }
 0x446   : > { %v1595_v45 = vadd.f32 %v1589_v48, %v1573_v41 }
 0x447   : > { %v1596_v46 = vadd.f32 %v1594_v38, %v1592_v63 }
 0x448   : > { %v1603_v47 = vadd.f32 %v1595_v45, %v1593_v43 }
 0x449   : > { %v1597_v49 = vrot.slane %v1596_v46, 4 }
 0x44a   : > { %v1604_v50 = vrot.slane %v1603_v47, 4 }
 0x44b   : > { %v1598_v51 = vadd.f32 %v1597_v49, %v1596_v46 }
 0x44c   : > { %v1605_v52 = vadd.f32 %v1604_v50, %v1603_v47 }
 0x44d   : > { %v1599_v42 = vrot.slane %v1598_v51, 2 }
 0x44e   : > { %v1606_v53 = vrot.slane %v1605_v52, 2 }
 0x44f   : > { %v1600_v39 = vadd.f32 %v1599_v42, %v1598_v51 }
 0x450   : > { %v1607_v54 = vadd.f32 %v1606_v53, %v1605_v52 }
 0x451   : > { %v1601_v55 = vrot.slane %v1600_v39, 1 }
 0x452   : > { %v1608_v56 = vrot.slane %v1607_v54, 1 }
 0x453   : > { %v1602_v59 = vadd.f32 %v1601_v55, %v1600_v39 }
 0x454   : > { %v1609_v57 = vadd.f32 %v1608_v56, %v1607_v54 }
 0x456   : > { %1707 = vmatprep.mubr.f32.mxu0 %v1609_v57 }
 0x457   : > { %1708 = vmatmul.mubr.f32.vlgmr.msra.gmra.mrb[8].mxu0 %v1602_v59 }
 0x52a   : > { %v2002_v40 = vpop.f32.mrb[8].mxu0 }
 0x52b   : > { %v2003_v61 = vpop.f32.mrb[9].mxu0 }
 0x52c   : > { %v2004_v62 = vadd.f32 %v2003_v61, %v2002_v40 }
 0x52e   : > { %v1710_v29 = vadd.f32 %v2004_v62, %v1642_v60 }
 0x530   : > { %v1713_v44 = vmax.f32 %v1710_v29, 0.0 }
 0x532   : > { %1960 = vmatmul.mubr.msk.f32.vlgmr.msra.gmra.mrb[16].mxu1 %vm1729_vm6, %v1713_v44 }
 0x605   : > { %v1804_v0 = vpop.f32.mrb[16].mxu1 }
 0x606   : > { %v1805_v3 = vadd.f32 %v1804_v0, %v1722_v2  ;;  %v1806_v4 = vpop.f32.mrb[17].mxu1 }
 0x607   : > { %v1807_v5 = vadd.f32 %v1806_v4, %v1726_v1 }
 0x608   : > { %v1961_v22 = vmul.f32 -1.442695, %v1805_v3 }
 0x609   : > { %v1962_v6 = vmul.f32 -1.442695, %v1807_v5 }
 0x60a   : > { %2519 = vpow2.f32 %v1961_v22 }
 0x60b   : > { %2521 = vpow2.f32 %v1962_v6 }
 0x614   : > { %v2520_v7 = vpop.eup %2519 }
 0x615   : > { %v2522_v10 = vpop.eup %2521  ;;  %v1815_v12 = vadd.f32 1.0, %v2520_v7 }
 0x616   : > { %v1816_v13 = vadd.f32 1.0, %v2522_v10 }
 0x617   : > { %2523 = vrcp.f32 %v1815_v12 }
 0x618   : > { %2525 = vrcp.f32 %v1816_v13 }
 0x621   : > { %v2524_v31 = vpop.eup %2523 }
 0x622   : > { %v2526_v14 = vpop.eup %2525  ;;  %v1824_v15 = vrot.slane %v2524_v31, %v2907_v33 }
 0x623   : > { %v1828_v16 = vrot.slane %v2526_v14, %v2907_v33  ;;  %v2529_v33 = vld [vmem:[%s2847_s27 + $0x8] sm:$0xff] }
 0x624   : > { %v1829_v17 = vmul.f32 %v1824_v15, %v1592_v63  ;;  %v1831_v30 = vmul.f32 %v1824_v15, %v1594_v38 }
 0x625   : > { %v1830_v18 = vmul.f32 %v1828_v16, %v1593_v43  ;;  %v1832_v19 = vmul.f32 %v1828_v16, %v1595_v45 }
 0x626   : > { %v1833_v23 = vadd.f32 %v2527_v20, %v1829_v17  ;;  %v1835_v25 = vadd.f32 %v2528_v24, %v1831_v30 }
 0x627   : > { %v1834_v9 = vadd.f32 %v2529_v33, %v1830_v18  ;;  %v1836_v8 = vadd.f32 %v2530_v26, %v1832_v19 }
 0x628   : > { %1837 = vst [vmem:[%s355_s23] sm:$0xff] %v1833_v23  ;;  %1839 = vst [vmem:[%s355_s23 + $0x10] sm:$0xff] %v1835_v25 }
 0x629   : > { %1838 = vst [vmem:[%s355_s23 + $0x8] sm:$0xff] %v1834_v9  ;;  %1840 = vst [vmem:[%s355_s23 + $0x18] sm:$0xff] %v1836_v8 }
 0x62a   : > { %2600 = shalt.err (!%p2597_p11)
}
 0x62b   : > { %s2601_s27 = scalar_lea.hbm %s3074_s21, 512  ;;  %s2605_s17 = scalar_lea.hbm %s3130_s9, 1024 }
 0x62c   : > { %p2602_p13 = scmp.ne.s32.totalorder %s3074_s21, %s2601_s27  ;;  %p2606_p6 = scmp.lt.u32.totalorder %s3074_s21, %s3130_s9 }
 0x62d   : > { %p2607_p9 = scmp.lt.u32.totalorder %s2605_s17, %s2601_s27  ;;  %p2609_p12 = scmp.lt.u32.totalorder %s2601_s27, %s3074_s21 }
 0x62e   : > { %p2603_p5 = pnand %p2602_p13, %p3149_p1 }
 0x62f   : > { %p2608_p10 = por %p2607_p9, %p2606_p6 }
 0x630   : > { %p2604_p0 = pneg %p2603_p5 }
 0x631   : > { %p2610_p2 = por %p2609_p12, %p2608_p10 }
 0x633   : > { %p2611_p3 = pnand %p2610_p2, %p2604_p0 }
 0x635   : > { %2614 = shalt.err (!%p2611_p3)
}
 0x636   : > { %s2665_s23 = smov 256   ;;  %s2666_s15 = smov 16  }
 0x637   : > { %2461 = dma.vmem_to_hbm [thread:$0]  (%p3149_p1), %s3076_s11, 512, %s3074_s21, %s3080_s13, %s2665_s23, %s2665_s23, %s2666_s15  }
 0x638 PF: > { %p2478_p4 = scmp.ge.s32.totalorder %s2657_s12, 2  ;;  %s1870_s18 = sand.u32 1, %s2645_s30  }
 0x639   : > { %p3150_p7 = scmp.ne.s32.totalorder %s3141_s20, 0  ;;  %s1871_s24 = scalar_lea.sflag [#allocation4], %s1870_s18 }
 0x63b   : > { %p2471_p8 = pnand %p2478_p4, %p3150_p7 }
 0x63d   : > { %2640 = dma.done.wait (!%p2471_p8), %s1871_s24, 512  }
 0x63e   : > { %2642 = vsyncadd (!%p2471_p8), %s1871_s24, 4294966784  ;;  %s3151_s12 = sld [smem:[#allocation12_spill]]  ;;  %s3152_s26 = sld [smem:[#allocation11_spill]] }
 0x63f   : > { %s3153_s11 = sld [smem:[#allocation13_spill]]  ;;  %s3154_s30 = smov %s2649_s10 }
 0x644   : > { %p21_p11 = scmp.ge.s32.totalorder %s3151_s12, 4   ;;  %s3155_s10 = smov %s3152_s26 }
 0x646   :  { %23 = sbr.rel (!%p21_p11) target bundleno = 5 (0x5), region = 104 }
 0x64d   :  { %1876 = vsyncpa [#allocation3], 1 }
 0x64e   :  { %1878 = vsyncpa [#allocation3 + $0x1], 1 }
 0x64f   :  { %1879 = vsyncpa [#allocation6], 1 }
 0x650   :  { %1880 = vsyncpa [#allocation4], 1 }
 0x651   :  { %1882 = vsyncpa [#allocation4 + $0x1], 1 }

</bundles_post_ra>
